<compile_context>
chip_gen: v5e
topology: v5e:2x2
jax: 0.10.0
libtpu: 0.0.40
codegen_flags: <defaults>
</compile_context>

<pallas_src>
import functools

import jax
import jax.numpy as jnp
from jax import lax
from jax.experimental import pallas as pl
from jax.experimental.pallas import tpu as pltpu


# -----------------------------------------------------------------------------
# Fused Pallas kernel: LSTM stack -> per-timestep FC head
# -----------------------------------------------------------------------------

def _fused_forward_kernel(*refs, L, n_fc):
    """Entire NetLSTM3 compute in one kernel (row gather happens in XLA).

    Inputs (VMEM resident):
      x_ref   : (T, B, I)   padded input sequence
      h0_ref  : (L, B, H)   initial hidden states
      c0_ref  : (L, B, H)   initial cell states
      per LSTM layer l : wih (I_l, 4H), whh (H, 4H), bias (1, 4H)  [b_ih+b_hh]
                         gate columns ordered [i | f | o | g]
      per FC layer i   : w (Fin, Fout), bias (1, Fout)  (last layer lane-padded)
    Outputs:
      fcout_ref : (T, B, OUTP)  FC head applied to every timestep (OUTP = 128k)
      hT_ref    : (L, B, H)     final hidden states
      cT_ref    : (L, B, H)     final cell states
    """
    n_in = 3 + 3 * L + 2 * n_fc
    x_ref, h0_ref, c0_ref = refs[0:3]
    lstm_refs = refs[3:3 + 3 * L]
    fc_refs = refs[3 + 3 * L:n_in]
    fcout_ref, hT_ref, cT_ref = refs[n_in:n_in + 3]

    T, B, _ = x_ref.shape
    H = h0_ref.shape[2]

    # ---------------- LSTM stack ----------------------------------------------
    # Activations stay in registers (lists of (B, .) values): leading-dim loads
    # only, no sublane-crossing slices/stores inside the serial recurrence.
    layer_in = [x_ref[t] for t in range(T)]          # T x (B, I)
    for l in range(L):
        wih = lstm_refs[3 * l][...]                  # (I_l, 4H)
        whh = lstm_refs[3 * l + 1][...]              # (H, 4H)
        bias = jnp.broadcast_to(lstm_refs[3 * l + 2][...], (B, 4 * H))  # hoisted

        # Hoisted input projection (+ bias): T independent small matmuls, off
        # the serial critical path; per-step it is a plain value lookup.
        pre = [jnp.dot(layer_in[t], wih, preferred_element_type=jnp.float32) + bias
               for t in range(T)]

        h = h0_ref[l]                                # (B, H)
        c = c0_ref[l]                                # (B, H)
        outs = []
        # Fully unrolled recurrence (T is a compile-time constant).
        for t in range(T):
            gates = jnp.dot(h, whh, preferred_element_type=jnp.float32) + pre[t]
            # Gate columns are [i | f | o | g]: one sigmoid pass over the three
            # sigmoid gates, one tanh pass over the cell gate (halved EUP work).
            sig = jax.nn.sigmoid(gates[:, 0:3 * H])
            g_g = jnp.tanh(gates[:, 3 * H:4 * H])
            i_g = sig[:, 0 * H:1 * H]
            f_g = sig[:, 1 * H:2 * H]
            o_g = sig[:, 2 * H:3 * H]
            c = f_g * c + i_g * g_g
            h = o_g * jnp.tanh(c)
            outs.append(h)
        hT_ref[l] = h
        cT_ref[l] = c
        layer_in = outs                              # feed next layer (values)

    # ---------------- FC head on every timestep (dropout = identity) ----------
    # Row-wise ops commute with the downstream row gather, so applying the FC
    # head to all T*B rows here and slicing outside is numerically identical to
    # gather-then-FC.  Output is lane-padded -> dense, unmasked stores.
    fcw = []
    for i in range(n_fc):
        w = fc_refs[2 * i][...]
        fb = jnp.broadcast_to(fc_refs[2 * i + 1][...], (B, w.shape[1]))
        fcw.append((w, fb))

    for t in range(T):
        y = layer_in[t]                              # (B, H)
        for i, (w, fb) in enumerate(fcw):
            y = jnp.dot(y, w, preferred_element_type=jnp.float32) + fb
            if i < n_fc - 1:
                y = jnp.maximum(y, 0.0)
        fcout_ref[t] = y.astype(fcout_ref.dtype)     # (B, OUTP), leading-dim store


_VMEM = pl.BlockSpec(memory_space=pltpu.MemorySpace.VMEM)


def fused_forward(params, x, h0, c0):
    """Single pallas_call wrapping the whole compute (shape-independent of x_lengths)."""
    T, B, _ = x.shape
    L, _, H = h0.shape
    fc_kernel = params["fc_pad"]
    n_fc = len(fc_kernel)
    outp = fc_kernel[-1][0].shape[1]                 # 128-padded output width

    inputs = [x, h0, c0]
    for wih, whh, b in params["lstm"]:
        inputs += [wih, whh, b]
    for w, b in fc_kernel:
        inputs += [w, b]

    kernel = functools.partial(_fused_forward_kernel, L=L, n_fc=n_fc)
    return pl.pallas_call(
        kernel,
        out_shape=(jax.ShapeDtypeStruct((T, B, outp), jnp.float32),
                   jax.ShapeDtypeStruct((L, B, H), jnp.float32),
                   jax.ShapeDtypeStruct((L, B, H), jnp.float32)),
        in_specs=[_VMEM] * len(inputs),
        out_specs=(_VMEM, _VMEM, _VMEM),
        compiler_params=pltpu.CompilerParams(vmem_limit_bytes=32 * 1024 * 1024),
    )(*inputs)


# -----------------------------------------------------------------------------
# Model: parameter init + forward (host-side glue is pure slicing of the output)
# -----------------------------------------------------------------------------

def init_params(key, input_size, output_size, lstm_layers, lstm_nodes,
                fc_layers, fc_nodes):
    """Weights stored pre-transposed (contraction dim first); gate cols (i,f,o,g)."""
    params = {"lstm": [], "fc": []}
    keys = iter(jax.random.split(key, 4 * lstm_layers + 2 * fc_layers))

    k_lstm = 1.0 / (lstm_nodes ** 0.5)
    for layer in range(lstm_layers):
        in_f = input_size if layer == 0 else lstm_nodes
        w_ih_t = jax.random.uniform(next(keys), (in_f, 4 * lstm_nodes),
                                    jnp.float32, -k_lstm, k_lstm)
        w_hh_t = jax.random.uniform(next(keys), (lstm_nodes, 4 * lstm_nodes),
                                    jnp.float32, -k_lstm, k_lstm)
        b_ih = jax.random.uniform(next(keys), (4 * lstm_nodes,),
                                  jnp.float32, -k_lstm, k_lstm)
        b_hh = jax.random.uniform(next(keys), (4 * lstm_nodes,),
                                  jnp.float32, -k_lstm, k_lstm)
        b = (b_ih + b_hh).reshape(1, 4 * lstm_nodes)
        params["lstm"].append((w_ih_t, w_hh_t, b))

    # FC stack (fc_layers >= 2 path of the module; fc_layers==1 -> single Linear)
    if fc_layers == 1:
        dims = [(lstm_nodes, 1)]
    else:
        dims = [(lstm_nodes, fc_nodes)]
        dims += [(fc_nodes, fc_nodes)] * (fc_layers - 2)
        dims += [(fc_nodes, output_size)]
    for in_f, out_f in dims:
        k_fc = 1.0 / (in_f ** 0.5)
        w_t = jax.random.uniform(next(keys), (in_f, out_f), jnp.float32, -k_fc, k_fc)
        b = jax.random.uniform(next(keys), (1, out_f), jnp.float32, -k_fc, k_fc)
        params["fc"].append((w_t, b))

    # Lane-dense copy of the last FC layer (zero-padded columns) for the kernel,
    # so the HBM writeback is an unmasked 128-lane store; wrapper slices back.
    out_f = params["fc"][-1][0].shape[1]
    outp = ((out_f + 127) // 128) * 128
    w_last, b_last = params["fc"][-1]
    w_pad = jnp.pad(w_last, ((0, 0), (0, outp - out_f)))
    b_pad = jnp.pad(b_last, ((0, 0), (0, outp - out_f)))
    params["fc_pad"] = params["fc"][:-1] + [(w_pad, b_pad)]
    return params


def netlstm3_forward(params, x, x_lengths, hidden, eff_hist=0, burn_in=0):
    """Mirrors NetLSTM3.forward (reset_hidden handled by caller supplying `hidden`).

    burn_in only shifts the gather window (the LSTM recurrence is continuous
    either way), so the whole forward runs as one fused kernel over the full
    padded sequence.  The x_lengths/eff_hist-dependent row gather is a pure
    slice/concat on the tiny (T, B, out) kernel output, done in XLA -- keeping
    the Pallas kernel shape-independent of x_lengths (single compile per model).
    """
    lengths = [int(v) for v in x_lengths]
    out_f = params["fc"][-1][0].shape[1]

    h0, c0 = hidden
    fcout, hT, cT = fused_forward(params, x, h0, c0)

    pieces = [fcout[eff_hist:eff_hist + lengths[i], i, :out_f]
              for i in range(len(lengths))]
    y = jnp.concatenate(pieces, axis=0)
    return y, (hT, cT)


# -----------------------------------------------------------------------------
# Pure-JAX reference (same math / same weight layout) for a correctness check
# -----------------------------------------------------------------------------

def _lstm_layer_ref(x, w_ih_t, w_hh_t, b, h0, c0):
    H = h0.shape[1]

    def step(carry, x_t):
        h, c = carry
        gates = (x_t @ w_ih_t + b) + h @ w_hh_t
        # gate columns stored as (i, f, o, g)
        i_g = jax.nn.sigmoid(gates[:, 0 * H:1 * H])
        f_g = jax.nn.sigmoid(gates[:, 1 * H:2 * H])
        o_g = jax.nn.sigmoid(gates[:, 2 * H:3 * H])
        g_g = jnp.tanh(gates[:, 3 * H:4 * H])
        c_new = f_g * c + i_g * g_g
        h_new = o_g * jnp.tanh(c_new)
        return (h_new, c_new), h_new

    (hT, cT), out = lax.scan(step, (h0, c0), x)
    return out, hT, cT


def _forward_ref(params, x, x_lengths, hidden, eff_hist=0, burn_in=0):
    h0s, c0s = hidden
    layer_in = x
    hTs, cTs = [], []
    for layer, (w_ih_t, w_hh_t, b) in enumerate(params["lstm"]):
        out, hT, cT = _lstm_layer_ref(layer_in, w_ih_t, w_hh_t, b,
                                      h0s[layer], c0s[layer])
        hTs.append(hT)
        cTs.append(cT)
        layer_in = out
    x_out = layer_in

    pieces = [x_out[eff_hist:eff_hist + int(x_lengths[i]), i, :]
              for i in range(x_out.shape[1])]
    y = jnp.concatenate(pieces, axis=0)

    fcs = params["fc"]
    for i in range(len(fcs) - 1):
        w_t, b = fcs[i]
        y = jnp.maximum(y @ w_t + b, 0.0)
    w_t, b = fcs[-1]
    y = y @ w_t + b
    return y, (jnp.stack(hTs), jnp.stack(cTs))


# -----------------------------------------------------------------------------
# Demo
# -----------------------------------------------------------------------------

if __name__ == "__main__":
    # Module hyper-parameters
    input_size = 4
    output_size = 3
    lstm_layers = 2
    lstm_nodes = 32
    fc_layers = 3
    fc_nodes = 16

    # Forward-call parameters
    T, B = 8, 2
    x_lengths = [6, 4]      # per-sequence valid lengths (Python ints, as in PyTorch)
    eff_hist = 2            # x_lengths_pad = [8, 6] <= T
    burn_in = 0

    key = jax.random.PRNGKey(0)
    k_param, k_x, k_h, k_c = jax.random.split(key, 4)

    params = init_params(k_param, input_size, output_size, lstm_layers,
                         lstm_nodes, fc_layers, fc_nodes)

    x = jax.random.normal(k_x, (T, B, input_size), jnp.float32)

    # reset_hidden=True path: hidden/cell ~ N(0,1), shape (lstm_layers, B, lstm_nodes)
    hidden = (jax.random.normal(k_h, (lstm_layers, B, lstm_nodes), jnp.float32),
              jax.random.normal(k_c, (lstm_layers, B, lstm_nodes), jnp.float32))

    y, (hT, cT) = netlstm3_forward(params, x, x_lengths, hidden,
                                   eff_hist=eff_hist, burn_in=burn_in)
    y = jax.block_until_ready(y)

    y_ref, (hT_ref, cT_ref) = _forward_ref(params, x, x_lengths, hidden,
                                           eff_hist=eff_hist, burn_in=burn_in)
    y_ref = jax.block_until_ready(y_ref)

    assert y.shape == (sum(x_lengths), output_size), y.shape
    assert jnp.allclose(y, y_ref, atol=1e-4, rtol=1e-4), \
        f"max abs err (y) = {jnp.max(jnp.abs(y - y_ref))}"
    assert jnp.allclose(hT, hT_ref, atol=1e-4, rtol=1e-4), \
        f"max abs err (hT) = {jnp.max(jnp.abs(hT - hT_ref))}"
    assert jnp.allclose(cT, cT_ref, atol=1e-4, rtol=1e-4), \
        f"max abs err (cT) = {jnp.max(jnp.abs(cT - cT_ref))}"

    print("KERNEL_OK")
</pallas_src>

<mosaic_0001>
module attributes {stable_mosaic.version = 11 : i64} {
  func.func @_fused_forward_kernel(%arg0: memref<8x2x4xf32, #tpu.memory_space<vmem>>, %arg1: memref<2x2x32xf32, #tpu.memory_space<vmem>>, %arg2: memref<2x2x32xf32, #tpu.memory_space<vmem>>, %arg3: memref<4x128xf32, #tpu.memory_space<vmem>>, %arg4: memref<32x128xf32, #tpu.memory_space<vmem>>, %arg5: memref<1x128xf32, #tpu.memory_space<vmem>>, %arg6: memref<32x128xf32, #tpu.memory_space<vmem>>, %arg7: memref<32x128xf32, #tpu.memory_space<vmem>>, %arg8: memref<1x128xf32, #tpu.memory_space<vmem>>, %arg9: memref<32x16xf32, #tpu.memory_space<vmem>>, %arg10: memref<1x16xf32, #tpu.memory_space<vmem>>, %arg11: memref<16x16xf32, #tpu.memory_space<vmem>>, %arg12: memref<1x16xf32, #tpu.memory_space<vmem>>, %arg13: memref<16x128xf32, #tpu.memory_space<vmem>>, %arg14: memref<1x128xf32, #tpu.memory_space<vmem>>, %arg15: memref<8x2x128xf32, #tpu.memory_space<vmem>>, %arg16: memref<2x2x32xf32, #tpu.memory_space<vmem>>, %arg17: memref<2x2x32xf32, #tpu.memory_space<vmem>>) attributes {dimension_semantics = [], scalar_prefetch = 0 : i64, scratch_operands = 0 : i64, tpu.core_type = #tpu.core_type<tc>} {
    %c0 = arith.constant 0 : index
    %c0_0 = arith.constant 0 : index
    %c0_1 = arith.constant 0 : index
    %0 = vector.load %arg0[%c0, %c0_0, %c0_1] : memref<8x2x4xf32, #tpu.memory_space<vmem>>, vector<1x2x4xf32>
    %1 = vector.shape_cast %0 : vector<1x2x4xf32> to vector<2x4xf32>
    %c1 = arith.constant 1 : index
    %c0_2 = arith.constant 0 : index
    %c0_3 = arith.constant 0 : index
    %2 = vector.load %arg0[%c1, %c0_2, %c0_3] : memref<8x2x4xf32, #tpu.memory_space<vmem>>, vector<1x2x4xf32>
    %3 = vector.shape_cast %2 : vector<1x2x4xf32> to vector<2x4xf32>
    %c2 = arith.constant 2 : index
    %c0_4 = arith.constant 0 : index
    %c0_5 = arith.constant 0 : index
    %4 = vector.load %arg0[%c2, %c0_4, %c0_5] : memref<8x2x4xf32, #tpu.memory_space<vmem>>, vector<1x2x4xf32>
    %5 = vector.shape_cast %4 : vector<1x2x4xf32> to vector<2x4xf32>
    %c3 = arith.constant 3 : index
    %c0_6 = arith.constant 0 : index
    %c0_7 = arith.constant 0 : index
    %6 = vector.load %arg0[%c3, %c0_6, %c0_7] : memref<8x2x4xf32, #tpu.memory_space<vmem>>, vector<1x2x4xf32>
    %7 = vector.shape_cast %6 : vector<1x2x4xf32> to vector<2x4xf32>
    %c4 = arith.constant 4 : index
    %c0_8 = arith.constant 0 : index
    %c0_9 = arith.constant 0 : index
    %8 = vector.load %arg0[%c4, %c0_8, %c0_9] : memref<8x2x4xf32, #tpu.memory_space<vmem>>, vector<1x2x4xf32>
    %9 = vector.shape_cast %8 : vector<1x2x4xf32> to vector<2x4xf32>
    %c5 = arith.constant 5 : index
    %c0_10 = arith.constant 0 : index
    %c0_11 = arith.constant 0 : index
    %10 = vector.load %arg0[%c5, %c0_10, %c0_11] : memref<8x2x4xf32, #tpu.memory_space<vmem>>, vector<1x2x4xf32>
    %11 = vector.shape_cast %10 : vector<1x2x4xf32> to vector<2x4xf32>
    %c6 = arith.constant 6 : index
    %c0_12 = arith.constant 0 : index
    %c0_13 = arith.constant 0 : index
    %12 = vector.load %arg0[%c6, %c0_12, %c0_13] : memref<8x2x4xf32, #tpu.memory_space<vmem>>, vector<1x2x4xf32>
    %13 = vector.shape_cast %12 : vector<1x2x4xf32> to vector<2x4xf32>
    %c7 = arith.constant 7 : index
    %c0_14 = arith.constant 0 : index
    %c0_15 = arith.constant 0 : index
    %14 = vector.load %arg0[%c7, %c0_14, %c0_15] : memref<8x2x4xf32, #tpu.memory_space<vmem>>, vector<1x2x4xf32>
    %15 = vector.shape_cast %14 : vector<1x2x4xf32> to vector<2x4xf32>
    %c0_16 = arith.constant 0 : index
    %c0_17 = arith.constant 0 : index
    %16 = vector.load %arg3[%c0_16, %c0_17] : memref<4x128xf32, #tpu.memory_space<vmem>>, vector<4x128xf32>
    %c0_18 = arith.constant 0 : index
    %c0_19 = arith.constant 0 : index
    %17 = vector.load %arg4[%c0_18, %c0_19] : memref<32x128xf32, #tpu.memory_space<vmem>>, vector<32x128xf32>
    %c0_20 = arith.constant 0 : index
    %c0_21 = arith.constant 0 : index
    %18 = vector.load %arg5[%c0_20, %c0_21] : memref<1x128xf32, #tpu.memory_space<vmem>>, vector<1x128xf32>
    %19 = vector.shape_cast %18 : vector<1x128xf32> to vector<1x128xf32>
    %20 = vector.broadcast %19 : vector<1x128xf32> to vector<2x128xf32>
    %cst = arith.constant dense<0.000000e+00> : vector<2x128xf32>
    %21 = tpu.matmul %1, %16, %cst {dimension_numbers = #tpu.dot_dimension_numbers<[1], [0], [0], [1], [0, 0, 1, 1], [], []>} : vector<2x4xf32>, vector<4x128xf32>, vector<2x128xf32> -> vector<2x128xf32>
    %22 = arith.addf %21, %20 : vector<2x128xf32>
    %cst_22 = arith.constant dense<0.000000e+00> : vector<2x128xf32>
    %23 = tpu.matmul %3, %16, %cst_22 {dimension_numbers = #tpu.dot_dimension_numbers<[1], [0], [0], [1], [0, 0, 1, 1], [], []>} : vector<2x4xf32>, vector<4x128xf32>, vector<2x128xf32> -> vector<2x128xf32>
    %24 = arith.addf %23, %20 : vector<2x128xf32>
    %cst_23 = arith.constant dense<0.000000e+00> : vector<2x128xf32>
    %25 = tpu.matmul %5, %16, %cst_23 {dimension_numbers = #tpu.dot_dimension_numbers<[1], [0], [0], [1], [0, 0, 1, 1], [], []>} : vector<2x4xf32>, vector<4x128xf32>, vector<2x128xf32> -> vector<2x128xf32>
    %26 = arith.addf %25, %20 : vector<2x128xf32>
    %cst_24 = arith.constant dense<0.000000e+00> : vector<2x128xf32>
    %27 = tpu.matmul %7, %16, %cst_24 {dimension_numbers = #tpu.dot_dimension_numbers<[1], [0], [0], [1], [0, 0, 1, 1], [], []>} : vector<2x4xf32>, vector<4x128xf32>, vector<2x128xf32> -> vector<2x128xf32>
    %28 = arith.addf %27, %20 : vector<2x128xf32>
    %cst_25 = arith.constant dense<0.000000e+00> : vector<2x128xf32>
    %29 = tpu.matmul %9, %16, %cst_25 {dimension_numbers = #tpu.dot_dimension_numbers<[1], [0], [0], [1], [0, 0, 1, 1], [], []>} : vector<2x4xf32>, vector<4x128xf32>, vector<2x128xf32> -> vector<2x128xf32>
    %30 = arith.addf %29, %20 : vector<2x128xf32>
    %cst_26 = arith.constant dense<0.000000e+00> : vector<2x128xf32>
    %31 = tpu.matmul %11, %16, %cst_26 {dimension_numbers = #tpu.dot_dimension_numbers<[1], [0], [0], [1], [0, 0, 1, 1], [], []>} : vector<2x4xf32>, vector<4x128xf32>, vector<2x128xf32> -> vector<2x128xf32>
    %32 = arith.addf %31, %20 : vector<2x128xf32>
    %cst_27 = arith.constant dense<0.000000e+00> : vector<2x128xf32>
    %33 = tpu.matmul %13, %16, %cst_27 {dimension_numbers = #tpu.dot_dimension_numbers<[1], [0], [0], [1], [0, 0, 1, 1], [], []>} : vector<2x4xf32>, vector<4x128xf32>, vector<2x128xf32> -> vector<2x128xf32>
    %34 = arith.addf %33, %20 : vector<2x128xf32>
    %cst_28 = arith.constant dense<0.000000e+00> : vector<2x128xf32>
    %35 = tpu.matmul %15, %16, %cst_28 {dimension_numbers = #tpu.dot_dimension_numbers<[1], [0], [0], [1], [0, 0, 1, 1], [], []>} : vector<2x4xf32>, vector<4x128xf32>, vector<2x128xf32> -> vector<2x128xf32>
    %36 = arith.addf %35, %20 : vector<2x128xf32>
    %c0_29 = arith.constant 0 : index
    %c0_30 = arith.constant 0 : index
    %c0_31 = arith.constant 0 : index
    %37 = vector.load %arg1[%c0_29, %c0_30, %c0_31] : memref<2x2x32xf32, #tpu.memory_space<vmem>>, vector<1x2x32xf32>
    %38 = vector.shape_cast %37 : vector<1x2x32xf32> to vector<2x32xf32>
    %c0_32 = arith.constant 0 : index
    %c0_33 = arith.constant 0 : index
    %c0_34 = arith.constant 0 : index
    %39 = vector.load %arg2[%c0_32, %c0_33, %c0_34] : memref<2x2x32xf32, #tpu.memory_space<vmem>>, vector<1x2x32xf32>
    %40 = vector.shape_cast %39 : vector<1x2x32xf32> to vector<2x32xf32>
    %cst_35 = arith.constant dense<0.000000e+00> : vector<2x128xf32>
    %41 = tpu.matmul %38, %17, %cst_35 {dimension_numbers = #tpu.dot_dimension_numbers<[1], [0], [0], [1], [0, 0, 1, 1], [], []>} : vector<2x32xf32>, vector<32x128xf32>, vector<2x128xf32> -> vector<2x128xf32>
    %42 = arith.addf %41, %22 : vector<2x128xf32>
    %43 = vector.extract_strided_slice %42 {offsets = [0, 0], sizes = [2, 96], strides = [1, 1]} : vector<2x128xf32> to vector<2x96xf32>
    %44 = arith.negf %43 : vector<2x96xf32>
    %45 = math.exp %44 : vector<2x96xf32>
    %cst_36 = arith.constant 1.000000e+00 : f32
    %46 = vector.broadcast %cst_36 : f32 to vector<2x96xf32>
    %47 = arith.addf %46, %45 : vector<2x96xf32>
    %48 = arith.divf %46, %47 : vector<2x96xf32>
    %49 = vector.extract_strided_slice %42 {offsets = [0, 96], sizes = [2, 32], strides = [1, 1]} : vector<2x128xf32> to vector<2x32xf32>
    %50 = math.tanh %49 : vector<2x32xf32>
    %51 = vector.extract_strided_slice %48 {offsets = [0, 0], sizes = [2, 32], strides = [1, 1]} : vector<2x96xf32> to vector<2x32xf32>
    %52 = vector.extract_strided_slice %48 {offsets = [0, 32], sizes = [2, 32], strides = [1, 1]} : vector<2x96xf32> to vector<2x32xf32>
    %53 = vector.extract_strided_slice %48 {offsets = [0, 64], sizes = [2, 32], strides = [1, 1]} : vector<2x96xf32> to vector<2x32xf32>
    %54 = arith.mulf %52, %40 : vector<2x32xf32>
    %55 = arith.mulf %51, %50 : vector<2x32xf32>
    %56 = arith.addf %54, %55 : vector<2x32xf32>
    %57 = math.tanh %56 : vector<2x32xf32>
    %58 = arith.mulf %53, %57 : vector<2x32xf32>
    %cst_37 = arith.constant dense<0.000000e+00> : vector<2x128xf32>
    %59 = tpu.matmul %58, %17, %cst_37 {dimension_numbers = #tpu.dot_dimension_numbers<[1], [0], [0], [1], [0, 0, 1, 1], [], []>} : vector<2x32xf32>, vector<32x128xf32>, vector<2x128xf32> -> vector<2x128xf32>
    %60 = arith.addf %59, %24 : vector<2x128xf32>
    %61 = vector.extract_strided_slice %60 {offsets = [0, 0], sizes = [2, 96], strides = [1, 1]} : vector<2x128xf32> to vector<2x96xf32>
    %62 = arith.negf %61 : vector<2x96xf32>
    %63 = math.exp %62 : vector<2x96xf32>
    %cst_38 = arith.constant 1.000000e+00 : f32
    %64 = vector.broadcast %cst_38 : f32 to vector<2x96xf32>
    %65 = arith.addf %64, %63 : vector<2x96xf32>
    %66 = arith.divf %64, %65 : vector<2x96xf32>
    %67 = vector.extract_strided_slice %60 {offsets = [0, 96], sizes = [2, 32], strides = [1, 1]} : vector<2x128xf32> to vector<2x32xf32>
    %68 = math.tanh %67 : vector<2x32xf32>
    %69 = vector.extract_strided_slice %66 {offsets = [0, 0], sizes = [2, 32], strides = [1, 1]} : vector<2x96xf32> to vector<2x32xf32>
    %70 = vector.extract_strided_slice %66 {offsets = [0, 32], sizes = [2, 32], strides = [1, 1]} : vector<2x96xf32> to vector<2x32xf32>
    %71 = vector.extract_strided_slice %66 {offsets = [0, 64], sizes = [2, 32], strides = [1, 1]} : vector<2x96xf32> to vector<2x32xf32>
    %72 = arith.mulf %70, %56 : vector<2x32xf32>
    %73 = arith.mulf %69, %68 : vector<2x32xf32>
    %74 = arith.addf %72, %73 : vector<2x32xf32>
    %75 = math.tanh %74 : vector<2x32xf32>
    %76 = arith.mulf %71, %75 : vector<2x32xf32>
    %cst_39 = arith.constant dense<0.000000e+00> : vector<2x128xf32>
    %77 = tpu.matmul %76, %17, %cst_39 {dimension_numbers = #tpu.dot_dimension_numbers<[1], [0], [0], [1], [0, 0, 1, 1], [], []>} : vector<2x32xf32>, vector<32x128xf32>, vector<2x128xf32> -> vector<2x128xf32>
    %78 = arith.addf %77, %26 : vector<2x128xf32>
    %79 = vector.extract_strided_slice %78 {offsets = [0, 0], sizes = [2, 96], strides = [1, 1]} : vector<2x128xf32> to vector<2x96xf32>
    %80 = arith.negf %79 : vector<2x96xf32>
    %81 = math.exp %80 : vector<2x96xf32>
    %cst_40 = arith.constant 1.000000e+00 : f32
    %82 = vector.broadcast %cst_40 : f32 to vector<2x96xf32>
    %83 = arith.addf %82, %81 : vector<2x96xf32>
    %84 = arith.divf %82, %83 : vector<2x96xf32>
    %85 = vector.extract_strided_slice %78 {offsets = [0, 96], sizes = [2, 32], strides = [1, 1]} : vector<2x128xf32> to vector<2x32xf32>
    %86 = math.tanh %85 : vector<2x32xf32>
    %87 = vector.extract_strided_slice %84 {offsets = [0, 0], sizes = [2, 32], strides = [1, 1]} : vector<2x96xf32> to vector<2x32xf32>
    %88 = vector.extract_strided_slice %84 {offsets = [0, 32], sizes = [2, 32], strides = [1, 1]} : vector<2x96xf32> to vector<2x32xf32>
    %89 = vector.extract_strided_slice %84 {offsets = [0, 64], sizes = [2, 32], strides = [1, 1]} : vector<2x96xf32> to vector<2x32xf32>
    %90 = arith.mulf %88, %74 : vector<2x32xf32>
    %91 = arith.mulf %87, %86 : vector<2x32xf32>
    %92 = arith.addf %90, %91 : vector<2x32xf32>
    %93 = math.tanh %92 : vector<2x32xf32>
    %94 = arith.mulf %89, %93 : vector<2x32xf32>
    %cst_41 = arith.constant dense<0.000000e+00> : vector<2x128xf32>
    %95 = tpu.matmul %94, %17, %cst_41 {dimension_numbers = #tpu.dot_dimension_numbers<[1], [0], [0], [1], [0, 0, 1, 1], [], []>} : vector<2x32xf32>, vector<32x128xf32>, vector<2x128xf32> -> vector<2x128xf32>
    %96 = arith.addf %95, %28 : vector<2x128xf32>
    %97 = vector.extract_strided_slice %96 {offsets = [0, 0], sizes = [2, 96], strides = [1, 1]} : vector<2x128xf32> to vector<2x96xf32>
    %98 = arith.negf %97 : vector<2x96xf32>
    %99 = math.exp %98 : vector<2x96xf32>
    %cst_42 = arith.constant 1.000000e+00 : f32
    %100 = vector.broadcast %cst_42 : f32 to vector<2x96xf32>
    %101 = arith.addf %100, %99 : vector<2x96xf32>
    %102 = arith.divf %100, %101 : vector<2x96xf32>
    %103 = vector.extract_strided_slice %96 {offsets = [0, 96], sizes = [2, 32], strides = [1, 1]} : vector<2x128xf32> to vector<2x32xf32>
    %104 = math.tanh %103 : vector<2x32xf32>
    %105 = vector.extract_strided_slice %102 {offsets = [0, 0], sizes = [2, 32], strides = [1, 1]} : vector<2x96xf32> to vector<2x32xf32>
    %106 = vector.extract_strided_slice %102 {offsets = [0, 32], sizes = [2, 32], strides = [1, 1]} : vector<2x96xf32> to vector<2x32xf32>
    %107 = vector.extract_strided_slice %102 {offsets = [0, 64], sizes = [2, 32], strides = [1, 1]} : vector<2x96xf32> to vector<2x32xf32>
    %108 = arith.mulf %106, %92 : vector<2x32xf32>
    %109 = arith.mulf %105, %104 : vector<2x32xf32>
    %110 = arith.addf %108, %109 : vector<2x32xf32>
    %111 = math.tanh %110 : vector<2x32xf32>
    %112 = arith.mulf %107, %111 : vector<2x32xf32>
    %cst_43 = arith.constant dense<0.000000e+00> : vector<2x128xf32>
    %113 = tpu.matmul %112, %17, %cst_43 {dimension_numbers = #tpu.dot_dimension_numbers<[1], [0], [0], [1], [0, 0, 1, 1], [], []>} : vector<2x32xf32>, vector<32x128xf32>, vector<2x128xf32> -> vector<2x128xf32>
    %114 = arith.addf %113, %30 : vector<2x128xf32>
    %115 = vector.extract_strided_slice %114 {offsets = [0, 0], sizes = [2, 96], strides = [1, 1]} : vector<2x128xf32> to vector<2x96xf32>
    %116 = arith.negf %115 : vector<2x96xf32>
    %117 = math.exp %116 : vector<2x96xf32>
    %cst_44 = arith.constant 1.000000e+00 : f32
    %118 = vector.broadcast %cst_44 : f32 to vector<2x96xf32>
    %119 = arith.addf %118, %117 : vector<2x96xf32>
    %120 = arith.divf %118, %119 : vector<2x96xf32>
    %121 = vector.extract_strided_slice %114 {offsets = [0, 96], sizes = [2, 32], strides = [1, 1]} : vector<2x128xf32> to vector<2x32xf32>
    %122 = math.tanh %121 : vector<2x32xf32>
    %123 = vector.extract_strided_slice %120 {offsets = [0, 0], sizes = [2, 32], strides = [1, 1]} : vector<2x96xf32> to vector<2x32xf32>
    %124 = vector.extract_strided_slice %120 {offsets = [0, 32], sizes = [2, 32], strides = [1, 1]} : vector<2x96xf32> to vector<2x32xf32>
    %125 = vector.extract_strided_slice %120 {offsets = [0, 64], sizes = [2, 32], strides = [1, 1]} : vector<2x96xf32> to vector<2x32xf32>
    %126 = arith.mulf %124, %110 : vector<2x32xf32>
    %127 = arith.mulf %123, %122 : vector<2x32xf32>
    %128 = arith.addf %126, %127 : vector<2x32xf32>
    %129 = math.tanh %128 : vector<2x32xf32>
    %130 = arith.mulf %125, %129 : vector<2x32xf32>
    %cst_45 = arith.constant dense<0.000000e+00> : vector<2x128xf32>
    %131 = tpu.matmul %130, %17, %cst_45 {dimension_numbers = #tpu.dot_dimension_numbers<[1], [0], [0], [1], [0, 0, 1, 1], [], []>} : vector<2x32xf32>, vector<32x128xf32>, vector<2x128xf32> -> vector<2x128xf32>
    %132 = arith.addf %131, %32 : vector<2x128xf32>
    %133 = vector.extract_strided_slice %132 {offsets = [0, 0], sizes = [2, 96], strides = [1, 1]} : vector<2x128xf32> to vector<2x96xf32>
    %134 = arith.negf %133 : vector<2x96xf32>
    %135 = math.exp %134 : vector<2x96xf32>
    %cst_46 = arith.constant 1.000000e+00 : f32
    %136 = vector.broadcast %cst_46 : f32 to vector<2x96xf32>
    %137 = arith.addf %136, %135 : vector<2x96xf32>
    %138 = arith.divf %136, %137 : vector<2x96xf32>
    %139 = vector.extract_strided_slice %132 {offsets = [0, 96], sizes = [2, 32], strides = [1, 1]} : vector<2x128xf32> to vector<2x32xf32>
    %140 = math.tanh %139 : vector<2x32xf32>
    %141 = vector.extract_strided_slice %138 {offsets = [0, 0], sizes = [2, 32], strides = [1, 1]} : vector<2x96xf32> to vector<2x32xf32>
    %142 = vector.extract_strided_slice %138 {offsets = [0, 32], sizes = [2, 32], strides = [1, 1]} : vector<2x96xf32> to vector<2x32xf32>
    %143 = vector.extract_strided_slice %138 {offsets = [0, 64], sizes = [2, 32], strides = [1, 1]} : vector<2x96xf32> to vector<2x32xf32>
    %144 = arith.mulf %142, %128 : vector<2x32xf32>
    %145 = arith.mulf %141, %140 : vector<2x32xf32>
    %146 = arith.addf %144, %145 : vector<2x32xf32>
    %147 = math.tanh %146 : vector<2x32xf32>
    %148 = arith.mulf %143, %147 : vector<2x32xf32>
    %cst_47 = arith.constant dense<0.000000e+00> : vector<2x128xf32>
    %149 = tpu.matmul %148, %17, %cst_47 {dimension_numbers = #tpu.dot_dimension_numbers<[1], [0], [0], [1], [0, 0, 1, 1], [], []>} : vector<2x32xf32>, vector<32x128xf32>, vector<2x128xf32> -> vector<2x128xf32>
    %150 = arith.addf %149, %34 : vector<2x128xf32>
    %151 = vector.extract_strided_slice %150 {offsets = [0, 0], sizes = [2, 96], strides = [1, 1]} : vector<2x128xf32> to vector<2x96xf32>
    %152 = arith.negf %151 : vector<2x96xf32>
    %153 = math.exp %152 : vector<2x96xf32>
    %cst_48 = arith.constant 1.000000e+00 : f32
    %154 = vector.broadcast %cst_48 : f32 to vector<2x96xf32>
    %155 = arith.addf %154, %153 : vector<2x96xf32>
    %156 = arith.divf %154, %155 : vector<2x96xf32>
    %157 = vector.extract_strided_slice %150 {offsets = [0, 96], sizes = [2, 32], strides = [1, 1]} : vector<2x128xf32> to vector<2x32xf32>
    %158 = math.tanh %157 : vector<2x32xf32>
    %159 = vector.extract_strided_slice %156 {offsets = [0, 0], sizes = [2, 32], strides = [1, 1]} : vector<2x96xf32> to vector<2x32xf32>
    %160 = vector.extract_strided_slice %156 {offsets = [0, 32], sizes = [2, 32], strides = [1, 1]} : vector<2x96xf32> to vector<2x32xf32>
    %161 = vector.extract_strided_slice %156 {offsets = [0, 64], sizes = [2, 32], strides = [1, 1]} : vector<2x96xf32> to vector<2x32xf32>
    %162 = arith.mulf %160, %146 : vector<2x32xf32>
    %163 = arith.mulf %159, %158 : vector<2x32xf32>
    %164 = arith.addf %162, %163 : vector<2x32xf32>
    %165 = math.tanh %164 : vector<2x32xf32>
    %166 = arith.mulf %161, %165 : vector<2x32xf32>
    %cst_49 = arith.constant dense<0.000000e+00> : vector<2x128xf32>
    %167 = tpu.matmul %166, %17, %cst_49 {dimension_numbers = #tpu.dot_dimension_numbers<[1], [0], [0], [1], [0, 0, 1, 1], [], []>} : vector<2x32xf32>, vector<32x128xf32>, vector<2x128xf32> -> vector<2x128xf32>
    %168 = arith.addf %167, %36 : vector<2x128xf32>
    %169 = vector.extract_strided_slice %168 {offsets = [0, 0], sizes = [2, 96], strides = [1, 1]} : vector<2x128xf32> to vector<2x96xf32>
    %170 = arith.negf %169 : vector<2x96xf32>
    %171 = math.exp %170 : vector<2x96xf32>
    %cst_50 = arith.constant 1.000000e+00 : f32
    %172 = vector.broadcast %cst_50 : f32 to vector<2x96xf32>
    %173 = arith.addf %172, %171 : vector<2x96xf32>
    %174 = arith.divf %172, %173 : vector<2x96xf32>
    %175 = vector.extract_strided_slice %168 {offsets = [0, 96], sizes = [2, 32], strides = [1, 1]} : vector<2x128xf32> to vector<2x32xf32>
    %176 = math.tanh %175 : vector<2x32xf32>
    %177 = vector.extract_strided_slice %174 {offsets = [0, 0], sizes = [2, 32], strides = [1, 1]} : vector<2x96xf32> to vector<2x32xf32>
    %178 = vector.extract_strided_slice %174 {offsets = [0, 32], sizes = [2, 32], strides = [1, 1]} : vector<2x96xf32> to vector<2x32xf32>
    %179 = vector.extract_strided_slice %174 {offsets = [0, 64], sizes = [2, 32], strides = [1, 1]} : vector<2x96xf32> to vector<2x32xf32>
    %180 = arith.mulf %178, %164 : vector<2x32xf32>
    %181 = arith.mulf %177, %176 : vector<2x32xf32>
    %182 = arith.addf %180, %181 : vector<2x32xf32>
    %183 = math.tanh %182 : vector<2x32xf32>
    %184 = arith.mulf %179, %183 : vector<2x32xf32>
    %c0_51 = arith.constant 0 : index
    %c0_52 = arith.constant 0 : index
    %c0_53 = arith.constant 0 : index
    %185 = vector.load %arg16[%c0_51, %c0_52, %c0_53] : memref<2x2x32xf32, #tpu.memory_space<vmem>>, vector<1x2x32xf32>
    %186 = vector.shape_cast %185 : vector<1x2x32xf32> to vector<2x32xf32>
    %187 = vector.shape_cast %184 : vector<2x32xf32> to vector<1x2x32xf32>
    tpu.vector_store %arg16[%c0_51, %c0_52, %c0_53], %187 {strides = array<i32>} : memref<2x2x32xf32, #tpu.memory_space<vmem>>, vector<1x2x32xf32>,
    %c0_54 = arith.constant 0 : index
    %c0_55 = arith.constant 0 : index
    %c0_56 = arith.constant 0 : index
    %188 = vector.load %arg17[%c0_54, %c0_55, %c0_56] : memref<2x2x32xf32, #tpu.memory_space<vmem>>, vector<1x2x32xf32>
    %189 = vector.shape_cast %188 : vector<1x2x32xf32> to vector<2x32xf32>
    %190 = vector.shape_cast %182 : vector<2x32xf32> to vector<1x2x32xf32>
    tpu.vector_store %arg17[%c0_54, %c0_55, %c0_56], %190 {strides = array<i32>} : memref<2x2x32xf32, #tpu.memory_space<vmem>>, vector<1x2x32xf32>,
    %c0_57 = arith.constant 0 : index
    %c0_58 = arith.constant 0 : index
    %191 = vector.load %arg6[%c0_57, %c0_58] : memref<32x128xf32, #tpu.memory_space<vmem>>, vector<32x128xf32>
    %c0_59 = arith.constant 0 : index
    %c0_60 = arith.constant 0 : index
    %192 = vector.load %arg7[%c0_59, %c0_60] : memref<32x128xf32, #tpu.memory_space<vmem>>, vector<32x128xf32>
    %c0_61 = arith.constant 0 : index
    %c0_62 = arith.constant 0 : index
    %193 = vector.load %arg8[%c0_61, %c0_62] : memref<1x128xf32, #tpu.memory_space<vmem>>, vector<1x128xf32>
    %194 = vector.shape_cast %193 : vector<1x128xf32> to vector<1x128xf32>
    %195 = vector.broadcast %194 : vector<1x128xf32> to vector<2x128xf32>
    %cst_63 = arith.constant dense<0.000000e+00> : vector<2x128xf32>
    %196 = tpu.matmul %58, %191, %cst_63 {dimension_numbers = #tpu.dot_dimension_numbers<[1], [0], [0], [1], [0, 0, 1, 1], [], []>} : vector<2x32xf32>, vector<32x128xf32>, vector<2x128xf32> -> vector<2x128xf32>
    %197 = arith.addf %196, %195 : vector<2x128xf32>
    %cst_64 = arith.constant dense<0.000000e+00> : vector<2x128xf32>
    %198 = tpu.matmul %76, %191, %cst_64 {dimension_numbers = #tpu.dot_dimension_numbers<[1], [0], [0], [1], [0, 0, 1, 1], [], []>} : vector<2x32xf32>, vector<32x128xf32>, vector<2x128xf32> -> vector<2x128xf32>
    %199 = arith.addf %198, %195 : vector<2x128xf32>
    %cst_65 = arith.constant dense<0.000000e+00> : vector<2x128xf32>
    %200 = tpu.matmul %94, %191, %cst_65 {dimension_numbers = #tpu.dot_dimension_numbers<[1], [0], [0], [1], [0, 0, 1, 1], [], []>} : vector<2x32xf32>, vector<32x128xf32>, vector<2x128xf32> -> vector<2x128xf32>
    %201 = arith.addf %200, %195 : vector<2x128xf32>
    %cst_66 = arith.constant dense<0.000000e+00> : vector<2x128xf32>
    %202 = tpu.matmul %112, %191, %cst_66 {dimension_numbers = #tpu.dot_dimension_numbers<[1], [0], [0], [1], [0, 0, 1, 1], [], []>} : vector<2x32xf32>, vector<32x128xf32>, vector<2x128xf32> -> vector<2x128xf32>
    %203 = arith.addf %202, %195 : vector<2x128xf32>
    %cst_67 = arith.constant dense<0.000000e+00> : vector<2x128xf32>
    %204 = tpu.matmul %130, %191, %cst_67 {dimension_numbers = #tpu.dot_dimension_numbers<[1], [0], [0], [1], [0, 0, 1, 1], [], []>} : vector<2x32xf32>, vector<32x128xf32>, vector<2x128xf32> -> vector<2x128xf32>
    %205 = arith.addf %204, %195 : vector<2x128xf32>
    %cst_68 = arith.constant dense<0.000000e+00> : vector<2x128xf32>
    %206 = tpu.matmul %148, %191, %cst_68 {dimension_numbers = #tpu.dot_dimension_numbers<[1], [0], [0], [1], [0, 0, 1, 1], [], []>} : vector<2x32xf32>, vector<32x128xf32>, vector<2x128xf32> -> vector<2x128xf32>
    %207 = arith.addf %206, %195 : vector<2x128xf32>
    %cst_69 = arith.constant dense<0.000000e+00> : vector<2x128xf32>
    %208 = tpu.matmul %166, %191, %cst_69 {dimension_numbers = #tpu.dot_dimension_numbers<[1], [0], [0], [1], [0, 0, 1, 1], [], []>} : vector<2x32xf32>, vector<32x128xf32>, vector<2x128xf32> -> vector<2x128xf32>
    %209 = arith.addf %208, %195 : vector<2x128xf32>
    %cst_70 = arith.constant dense<0.000000e+00> : vector<2x128xf32>
    %210 = tpu.matmul %184, %191, %cst_70 {dimension_numbers = #tpu.dot_dimension_numbers<[1], [0], [0], [1], [0, 0, 1, 1], [], []>} : vector<2x32xf32>, vector<32x128xf32>, vector<2x128xf32> -> vector<2x128xf32>
    %211 = arith.addf %210, %195 : vector<2x128xf32>
    %c1_71 = arith.constant 1 : index
    %c0_72 = arith.constant 0 : index
    %c0_73 = arith.constant 0 : index
    %212 = vector.load %arg1[%c1_71, %c0_72, %c0_73] : memref<2x2x32xf32, #tpu.memory_space<vmem>>, vector<1x2x32xf32>
    %213 = vector.shape_cast %212 : vector<1x2x32xf32> to vector<2x32xf32>
    %c1_74 = arith.constant 1 : index
    %c0_75 = arith.constant 0 : index
    %c0_76 = arith.constant 0 : index
    %214 = vector.load %arg2[%c1_74, %c0_75, %c0_76] : memref<2x2x32xf32, #tpu.memory_space<vmem>>, vector<1x2x32xf32>
    %215 = vector.shape_cast %214 : vector<1x2x32xf32> to vector<2x32xf32>
    %cst_77 = arith.constant dense<0.000000e+00> : vector<2x128xf32>
    %216 = tpu.matmul %213, %192, %cst_77 {dimension_numbers = #tpu.dot_dimension_numbers<[1], [0], [0], [1], [0, 0, 1, 1], [], []>} : vector<2x32xf32>, vector<32x128xf32>, vector<2x128xf32> -> vector<2x128xf32>
    %217 = arith.addf %216, %197 : vector<2x128xf32>
    %218 = vector.extract_strided_slice %217 {offsets = [0, 0], sizes = [2, 96], strides = [1, 1]} : vector<2x128xf32> to vector<2x96xf32>
    %219 = arith.negf %218 : vector<2x96xf32>
    %220 = math.exp %219 : vector<2x96xf32>
    %cst_78 = arith.constant 1.000000e+00 : f32
    %221 = vector.broadcast %cst_78 : f32 to vector<2x96xf32>
    %222 = arith.addf %221, %220 : vector<2x96xf32>
    %223 = arith.divf %221, %222 : vector<2x96xf32>
    %224 = vector.extract_strided_slice %217 {offsets = [0, 96], sizes = [2, 32], strides = [1, 1]} : vector<2x128xf32> to vector<2x32xf32>
    %225 = math.tanh %224 : vector<2x32xf32>
    %226 = vector.extract_strided_slice %223 {offsets = [0, 0], sizes = [2, 32], strides = [1, 1]} : vector<2x96xf32> to vector<2x32xf32>
    %227 = vector.extract_strided_slice %223 {offsets = [0, 32], sizes = [2, 32], strides = [1, 1]} : vector<2x96xf32> to vector<2x32xf32>
    %228 = vector.extract_strided_slice %223 {offsets = [0, 64], sizes = [2, 32], strides = [1, 1]} : vector<2x96xf32> to vector<2x32xf32>
    %229 = arith.mulf %227, %215 : vector<2x32xf32>
    %230 = arith.mulf %226, %225 : vector<2x32xf32>
    %231 = arith.addf %229, %230 : vector<2x32xf32>
    %232 = math.tanh %231 : vector<2x32xf32>
    %233 = arith.mulf %228, %232 : vector<2x32xf32>
    %cst_79 = arith.constant dense<0.000000e+00> : vector<2x128xf32>
    %234 = tpu.matmul %233, %192, %cst_79 {dimension_numbers = #tpu.dot_dimension_numbers<[1], [0], [0], [1], [0, 0, 1, 1], [], []>} : vector<2x32xf32>, vector<32x128xf32>, vector<2x128xf32> -> vector<2x128xf32>
    %235 = arith.addf %234, %199 : vector<2x128xf32>
    %236 = vector.extract_strided_slice %235 {offsets = [0, 0], sizes = [2, 96], strides = [1, 1]} : vector<2x128xf32> to vector<2x96xf32>
    %237 = arith.negf %236 : vector<2x96xf32>
    %238 = math.exp %237 : vector<2x96xf32>
    %cst_80 = arith.constant 1.000000e+00 : f32
    %239 = vector.broadcast %cst_80 : f32 to vector<2x96xf32>
    %240 = arith.addf %239, %238 : vector<2x96xf32>
    %241 = arith.divf %239, %240 : vector<2x96xf32>
    %242 = vector.extract_strided_slice %235 {offsets = [0, 96], sizes = [2, 32], strides = [1, 1]} : vector<2x128xf32> to vector<2x32xf32>
    %243 = math.tanh %242 : vector<2x32xf32>
    %244 = vector.extract_strided_slice %241 {offsets = [0, 0], sizes = [2, 32], strides = [1, 1]} : vector<2x96xf32> to vector<2x32xf32>
    %245 = vector.extract_strided_slice %241 {offsets = [0, 32], sizes = [2, 32], strides = [1, 1]} : vector<2x96xf32> to vector<2x32xf32>
    %246 = vector.extract_strided_slice %241 {offsets = [0, 64], sizes = [2, 32], strides = [1, 1]} : vector<2x96xf32> to vector<2x32xf32>
    %247 = arith.mulf %245, %231 : vector<2x32xf32>
    %248 = arith.mulf %244, %243 : vector<2x32xf32>
    %249 = arith.addf %247, %248 : vector<2x32xf32>
    %250 = math.tanh %249 : vector<2x32xf32>
    %251 = arith.mulf %246, %250 : vector<2x32xf32>
    %cst_81 = arith.constant dense<0.000000e+00> : vector<2x128xf32>
    %252 = tpu.matmul %251, %192, %cst_81 {dimension_numbers = #tpu.dot_dimension_numbers<[1], [0], [0], [1], [0, 0, 1, 1], [], []>} : vector<2x32xf32>, vector<32x128xf32>, vector<2x128xf32> -> vector<2x128xf32>
    %253 = arith.addf %252, %201 : vector<2x128xf32>
    %254 = vector.extract_strided_slice %253 {offsets = [0, 0], sizes = [2, 96], strides = [1, 1]} : vector<2x128xf32> to vector<2x96xf32>
    %255 = arith.negf %254 : vector<2x96xf32>
    %256 = math.exp %255 : vector<2x96xf32>
    %cst_82 = arith.constant 1.000000e+00 : f32
    %257 = vector.broadcast %cst_82 : f32 to vector<2x96xf32>
    %258 = arith.addf %257, %256 : vector<2x96xf32>
    %259 = arith.divf %257, %258 : vector<2x96xf32>
    %260 = vector.extract_strided_slice %253 {offsets = [0, 96], sizes = [2, 32], strides = [1, 1]} : vector<2x128xf32> to vector<2x32xf32>
    %261 = math.tanh %260 : vector<2x32xf32>
    %262 = vector.extract_strided_slice %259 {offsets = [0, 0], sizes = [2, 32], strides = [1, 1]} : vector<2x96xf32> to vector<2x32xf32>
    %263 = vector.extract_strided_slice %259 {offsets = [0, 32], sizes = [2, 32], strides = [1, 1]} : vector<2x96xf32> to vector<2x32xf32>
    %264 = vector.extract_strided_slice %259 {offsets = [0, 64], sizes = [2, 32], strides = [1, 1]} : vector<2x96xf32> to vector<2x32xf32>
    %265 = arith.mulf %263, %249 : vector<2x32xf32>
    %266 = arith.mulf %262, %261 : vector<2x32xf32>
    %267 = arith.addf %265, %266 : vector<2x32xf32>
    %268 = math.tanh %267 : vector<2x32xf32>
    %269 = arith.mulf %264, %268 : vector<2x32xf32>
    %cst_83 = arith.constant dense<0.000000e+00> : vector<2x128xf32>
    %270 = tpu.matmul %269, %192, %cst_83 {dimension_numbers = #tpu.dot_dimension_numbers<[1], [0], [0], [1], [0, 0, 1, 1], [], []>} : vector<2x32xf32>, vector<32x128xf32>, vector<2x128xf32> -> vector<2x128xf32>
    %271 = arith.addf %270, %203 : vector<2x128xf32>
    %272 = vector.extract_strided_slice %271 {offsets = [0, 0], sizes = [2, 96], strides = [1, 1]} : vector<2x128xf32> to vector<2x96xf32>
    %273 = arith.negf %272 : vector<2x96xf32>
    %274 = math.exp %273 : vector<2x96xf32>
    %cst_84 = arith.constant 1.000000e+00 : f32
    %275 = vector.broadcast %cst_84 : f32 to vector<2x96xf32>
    %276 = arith.addf %275, %274 : vector<2x96xf32>
    %277 = arith.divf %275, %276 : vector<2x96xf32>
    %278 = vector.extract_strided_slice %271 {offsets = [0, 96], sizes = [2, 32], strides = [1, 1]} : vector<2x128xf32> to vector<2x32xf32>
    %279 = math.tanh %278 : vector<2x32xf32>
    %280 = vector.extract_strided_slice %277 {offsets = [0, 0], sizes = [2, 32], strides = [1, 1]} : vector<2x96xf32> to vector<2x32xf32>
    %281 = vector.extract_strided_slice %277 {offsets = [0, 32], sizes = [2, 32], strides = [1, 1]} : vector<2x96xf32> to vector<2x32xf32>
    %282 = vector.extract_strided_slice %277 {offsets = [0, 64], sizes = [2, 32], strides = [1, 1]} : vector<2x96xf32> to vector<2x32xf32>
    %283 = arith.mulf %281, %267 : vector<2x32xf32>
    %284 = arith.mulf %280, %279 : vector<2x32xf32>
    %285 = arith.addf %283, %284 : vector<2x32xf32>
    %286 = math.tanh %285 : vector<2x32xf32>
    %287 = arith.mulf %282, %286 : vector<2x32xf32>
    %cst_85 = arith.constant dense<0.000000e+00> : vector<2x128xf32>
    %288 = tpu.matmul %287, %192, %cst_85 {dimension_numbers = #tpu.dot_dimension_numbers<[1], [0], [0], [1], [0, 0, 1, 1], [], []>} : vector<2x32xf32>, vector<32x128xf32>, vector<2x128xf32> -> vector<2x128xf32>
    %289 = arith.addf %288, %205 : vector<2x128xf32>
    %290 = vector.extract_strided_slice %289 {offsets = [0, 0], sizes = [2, 96], strides = [1, 1]} : vector<2x128xf32> to vector<2x96xf32>
    %291 = arith.negf %290 : vector<2x96xf32>
    %292 = math.exp %291 : vector<2x96xf32>
    %cst_86 = arith.constant 1.000000e+00 : f32
    %293 = vector.broadcast %cst_86 : f32 to vector<2x96xf32>
    %294 = arith.addf %293, %292 : vector<2x96xf32>
    %295 = arith.divf %293, %294 : vector<2x96xf32>
    %296 = vector.extract_strided_slice %289 {offsets = [0, 96], sizes = [2, 32], strides = [1, 1]} : vector<2x128xf32> to vector<2x32xf32>
    %297 = math.tanh %296 : vector<2x32xf32>
    %298 = vector.extract_strided_slice %295 {offsets = [0, 0], sizes = [2, 32], strides = [1, 1]} : vector<2x96xf32> to vector<2x32xf32>
    %299 = vector.extract_strided_slice %295 {offsets = [0, 32], sizes = [2, 32], strides = [1, 1]} : vector<2x96xf32> to vector<2x32xf32>
    %300 = vector.extract_strided_slice %295 {offsets = [0, 64], sizes = [2, 32], strides = [1, 1]} : vector<2x96xf32> to vector<2x32xf32>
    %301 = arith.mulf %299, %285 : vector<2x32xf32>
    %302 = arith.mulf %298, %297 : vector<2x32xf32>
    %303 = arith.addf %301, %302 : vector<2x32xf32>
    %304 = math.tanh %303 : vector<2x32xf32>
    %305 = arith.mulf %300, %304 : vector<2x32xf32>
    %cst_87 = arith.constant dense<0.000000e+00> : vector<2x128xf32>
    %306 = tpu.matmul %305, %192, %cst_87 {dimension_numbers = #tpu.dot_dimension_numbers<[1], [0], [0], [1], [0, 0, 1, 1], [], []>} : vector<2x32xf32>, vector<32x128xf32>, vector<2x128xf32> -> vector<2x128xf32>
    %307 = arith.addf %306, %207 : vector<2x128xf32>
    %308 = vector.extract_strided_slice %307 {offsets = [0, 0], sizes = [2, 96], strides = [1, 1]} : vector<2x128xf32> to vector<2x96xf32>
    %309 = arith.negf %308 : vector<2x96xf32>
    %310 = math.exp %309 : vector<2x96xf32>
    %cst_88 = arith.constant 1.000000e+00 : f32
    %311 = vector.broadcast %cst_88 : f32 to vector<2x96xf32>
    %312 = arith.addf %311, %310 : vector<2x96xf32>
    %313 = arith.divf %311, %312 : vector<2x96xf32>
    %314 = vector.extract_strided_slice %307 {offsets = [0, 96], sizes = [2, 32], strides = [1, 1]} : vector<2x128xf32> to vector<2x32xf32>
    %315 = math.tanh %314 : vector<2x32xf32>
    %316 = vector.extract_strided_slice %313 {offsets = [0, 0], sizes = [2, 32], strides = [1, 1]} : vector<2x96xf32> to vector<2x32xf32>
    %317 = vector.extract_strided_slice %313 {offsets = [0, 32], sizes = [2, 32], strides = [1, 1]} : vector<2x96xf32> to vector<2x32xf32>
    %318 = vector.extract_strided_slice %313 {offsets = [0, 64], sizes = [2, 32], strides = [1, 1]} : vector<2x96xf32> to vector<2x32xf32>
    %319 = arith.mulf %317, %303 : vector<2x32xf32>
    %320 = arith.mulf %316, %315 : vector<2x32xf32>
    %321 = arith.addf %319, %320 : vector<2x32xf32>
    %322 = math.tanh %321 : vector<2x32xf32>
    %323 = arith.mulf %318, %322 : vector<2x32xf32>
    %cst_89 = arith.constant dense<0.000000e+00> : vector<2x128xf32>
    %324 = tpu.matmul %323, %192, %cst_89 {dimension_numbers = #tpu.dot_dimension_numbers<[1], [0], [0], [1], [0, 0, 1, 1], [], []>} : vector<2x32xf32>, vector<32x128xf32>, vector<2x128xf32> -> vector<2x128xf32>
    %325 = arith.addf %324, %209 : vector<2x128xf32>
    %326 = vector.extract_strided_slice %325 {offsets = [0, 0], sizes = [2, 96], strides = [1, 1]} : vector<2x128xf32> to vector<2x96xf32>
    %327 = arith.negf %326 : vector<2x96xf32>
    %328 = math.exp %327 : vector<2x96xf32>
    %cst_90 = arith.constant 1.000000e+00 : f32
    %329 = vector.broadcast %cst_90 : f32 to vector<2x96xf32>
    %330 = arith.addf %329, %328 : vector<2x96xf32>
    %331 = arith.divf %329, %330 : vector<2x96xf32>
    %332 = vector.extract_strided_slice %325 {offsets = [0, 96], sizes = [2, 32], strides = [1, 1]} : vector<2x128xf32> to vector<2x32xf32>
    %333 = math.tanh %332 : vector<2x32xf32>
    %334 = vector.extract_strided_slice %331 {offsets = [0, 0], sizes = [2, 32], strides = [1, 1]} : vector<2x96xf32> to vector<2x32xf32>
    %335 = vector.extract_strided_slice %331 {offsets = [0, 32], sizes = [2, 32], strides = [1, 1]} : vector<2x96xf32> to vector<2x32xf32>
    %336 = vector.extract_strided_slice %331 {offsets = [0, 64], sizes = [2, 32], strides = [1, 1]} : vector<2x96xf32> to vector<2x32xf32>
    %337 = arith.mulf %335, %321 : vector<2x32xf32>
    %338 = arith.mulf %334, %333 : vector<2x32xf32>
    %339 = arith.addf %337, %338 : vector<2x32xf32>
    %340 = math.tanh %339 : vector<2x32xf32>
    %341 = arith.mulf %336, %340 : vector<2x32xf32>
    %cst_91 = arith.constant dense<0.000000e+00> : vector<2x128xf32>
    %342 = tpu.matmul %341, %192, %cst_91 {dimension_numbers = #tpu.dot_dimension_numbers<[1], [0], [0], [1], [0, 0, 1, 1], [], []>} : vector<2x32xf32>, vector<32x128xf32>, vector<2x128xf32> -> vector<2x128xf32>
    %343 = arith.addf %342, %211 : vector<2x128xf32>
    %344 = vector.extract_strided_slice %343 {offsets = [0, 0], sizes = [2, 96], strides = [1, 1]} : vector<2x128xf32> to vector<2x96xf32>
    %345 = arith.negf %344 : vector<2x96xf32>
    %346 = math.exp %345 : vector<2x96xf32>
    %cst_92 = arith.constant 1.000000e+00 : f32
    %347 = vector.broadcast %cst_92 : f32 to vector<2x96xf32>
    %348 = arith.addf %347, %346 : vector<2x96xf32>
    %349 = arith.divf %347, %348 : vector<2x96xf32>
    %350 = vector.extract_strided_slice %343 {offsets = [0, 96], sizes = [2, 32], strides = [1, 1]} : vector<2x128xf32> to vector<2x32xf32>
    %351 = math.tanh %350 : vector<2x32xf32>
    %352 = vector.extract_strided_slice %349 {offsets = [0, 0], sizes = [2, 32], strides = [1, 1]} : vector<2x96xf32> to vector<2x32xf32>
    %353 = vector.extract_strided_slice %349 {offsets = [0, 32], sizes = [2, 32], strides = [1, 1]} : vector<2x96xf32> to vector<2x32xf32>
    %354 = vector.extract_strided_slice %349 {offsets = [0, 64], sizes = [2, 32], strides = [1, 1]} : vector<2x96xf32> to vector<2x32xf32>
    %355 = arith.mulf %353, %339 : vector<2x32xf32>
    %356 = arith.mulf %352, %351 : vector<2x32xf32>
    %357 = arith.addf %355, %356 : vector<2x32xf32>
    %358 = math.tanh %357 : vector<2x32xf32>
    %359 = arith.mulf %354, %358 : vector<2x32xf32>
    %c1_93 = arith.constant 1 : index
    %c0_94 = arith.constant 0 : index
    %c0_95 = arith.constant 0 : index
    %360 = vector.load %arg16[%c1_93, %c0_94, %c0_95] : memref<2x2x32xf32, #tpu.memory_space<vmem>>, vector<1x2x32xf32>
    %361 = vector.shape_cast %360 : vector<1x2x32xf32> to vector<2x32xf32>
    %362 = vector.shape_cast %359 : vector<2x32xf32> to vector<1x2x32xf32>
    tpu.vector_store %arg16[%c1_93, %c0_94, %c0_95], %362 {strides = array<i32>} : memref<2x2x32xf32, #tpu.memory_space<vmem>>, vector<1x2x32xf32>,
    %c1_96 = arith.constant 1 : index
    %c0_97 = arith.constant 0 : index
    %c0_98 = arith.constant 0 : index
    %363 = vector.load %arg17[%c1_96, %c0_97, %c0_98] : memref<2x2x32xf32, #tpu.memory_space<vmem>>, vector<1x2x32xf32>
    %364 = vector.shape_cast %363 : vector<1x2x32xf32> to vector<2x32xf32>
    %365 = vector.shape_cast %357 : vector<2x32xf32> to vector<1x2x32xf32>
    tpu.vector_store %arg17[%c1_96, %c0_97, %c0_98], %365 {strides = array<i32>} : memref<2x2x32xf32, #tpu.memory_space<vmem>>, vector<1x2x32xf32>,
    %c0_99 = arith.constant 0 : index
    %c0_100 = arith.constant 0 : index
    %366 = vector.load %arg9[%c0_99, %c0_100] : memref<32x16xf32, #tpu.memory_space<vmem>>, vector<32x16xf32>
    %c0_101 = arith.constant 0 : index
    %c0_102 = arith.constant 0 : index
    %367 = vector.load %arg10[%c0_101, %c0_102] : memref<1x16xf32, #tpu.memory_space<vmem>>, vector<1x16xf32>
    %368 = vector.shape_cast %367 : vector<1x16xf32> to vector<1x16xf32>
    %369 = vector.broadcast %368 : vector<1x16xf32> to vector<2x16xf32>
    %c0_103 = arith.constant 0 : index
    %c0_104 = arith.constant 0 : index
    %370 = vector.load %arg11[%c0_103, %c0_104] : memref<16x16xf32, #tpu.memory_space<vmem>>, vector<16x16xf32>
    %c0_105 = arith.constant 0 : index
    %c0_106 = arith.constant 0 : index
    %371 = vector.load %arg12[%c0_105, %c0_106] : memref<1x16xf32, #tpu.memory_space<vmem>>, vector<1x16xf32>
    %372 = vector.shape_cast %371 : vector<1x16xf32> to vector<1x16xf32>
    %373 = vector.broadcast %372 : vector<1x16xf32> to vector<2x16xf32>
    %c0_107 = arith.constant 0 : index
    %c0_108 = arith.constant 0 : index
    %374 = vector.load %arg13[%c0_107, %c0_108] : memref<16x128xf32, #tpu.memory_space<vmem>>, vector<16x128xf32>
    %c0_109 = arith.constant 0 : index
    %c0_110 = arith.constant 0 : index
    %375 = vector.load %arg14[%c0_109, %c0_110] : memref<1x128xf32, #tpu.memory_space<vmem>>, vector<1x128xf32>
    %376 = vector.shape_cast %375 : vector<1x128xf32> to vector<1x128xf32>
    %377 = vector.broadcast %376 : vector<1x128xf32> to vector<2x128xf32>
    %cst_111 = arith.constant dense<0.000000e+00> : vector<2x16xf32>
    %378 = tpu.matmul %233, %366, %cst_111 {dimension_numbers = #tpu.dot_dimension_numbers<[1], [0], [0], [1], [0, 0, 1, 1], [], []>} : vector<2x32xf32>, vector<32x16xf32>, vector<2x16xf32> -> vector<2x16xf32>
    %379 = arith.addf %378, %369 : vector<2x16xf32>
    %cst_112 = arith.constant 0.000000e+00 : f32
    %380 = vector.broadcast %cst_112 : f32 to vector<2x16xf32>
    %381 = arith.maximumf %379, %380 : vector<2x16xf32>
    %cst_113 = arith.constant dense<0.000000e+00> : vector<2x16xf32>
    %382 = tpu.matmul %381, %370, %cst_113 {dimension_numbers = #tpu.dot_dimension_numbers<[1], [0], [0], [1], [0, 0, 1, 1], [], []>} : vector<2x16xf32>, vector<16x16xf32>, vector<2x16xf32> -> vector<2x16xf32>
    %383 = arith.addf %382, %373 : vector<2x16xf32>
    %cst_114 = arith.constant 0.000000e+00 : f32
    %384 = vector.broadcast %cst_114 : f32 to vector<2x16xf32>
    %385 = arith.maximumf %383, %384 : vector<2x16xf32>
    %cst_115 = arith.constant dense<0.000000e+00> : vector<2x128xf32>
    %386 = tpu.matmul %385, %374, %cst_115 {dimension_numbers = #tpu.dot_dimension_numbers<[1], [0], [0], [1], [0, 0, 1, 1], [], []>} : vector<2x16xf32>, vector<16x128xf32>, vector<2x128xf32> -> vector<2x128xf32>
    %387 = arith.addf %386, %377 : vector<2x128xf32>
    %c0_116 = arith.constant 0 : index
    %c0_117 = arith.constant 0 : index
    %c0_118 = arith.constant 0 : index
    %388 = vector.load %arg15[%c0_116, %c0_117, %c0_118] : memref<8x2x128xf32, #tpu.memory_space<vmem>>, vector<1x2x128xf32>
    %389 = vector.shape_cast %388 : vector<1x2x128xf32> to vector<2x128xf32>
    %390 = vector.shape_cast %387 : vector<2x128xf32> to vector<1x2x128xf32>
    tpu.vector_store %arg15[%c0_116, %c0_117, %c0_118], %390 {strides = array<i32>} : memref<8x2x128xf32, #tpu.memory_space<vmem>>, vector<1x2x128xf32>,
    %cst_119 = arith.constant dense<0.000000e+00> : vector<2x16xf32>
    %391 = tpu.matmul %251, %366, %cst_119 {dimension_numbers = #tpu.dot_dimension_numbers<[1], [0], [0], [1], [0, 0, 1, 1], [], []>} : vector<2x32xf32>, vector<32x16xf32>, vector<2x16xf32> -> vector<2x16xf32>
    %392 = arith.addf %391, %369 : vector<2x16xf32>
    %cst_120 = arith.constant 0.000000e+00 : f32
    %393 = vector.broadcast %cst_120 : f32 to vector<2x16xf32>
    %394 = arith.maximumf %392, %393 : vector<2x16xf32>
    %cst_121 = arith.constant dense<0.000000e+00> : vector<2x16xf32>
    %395 = tpu.matmul %394, %370, %cst_121 {dimension_numbers = #tpu.dot_dimension_numbers<[1], [0], [0], [1], [0, 0, 1, 1], [], []>} : vector<2x16xf32>, vector<16x16xf32>, vector<2x16xf32> -> vector<2x16xf32>
    %396 = arith.addf %395, %373 : vector<2x16xf32>
    %cst_122 = arith.constant 0.000000e+00 : f32
    %397 = vector.broadcast %cst_122 : f32 to vector<2x16xf32>
    %398 = arith.maximumf %396, %397 : vector<2x16xf32>
    %cst_123 = arith.constant dense<0.000000e+00> : vector<2x128xf32>
    %399 = tpu.matmul %398, %374, %cst_123 {dimension_numbers = #tpu.dot_dimension_numbers<[1], [0], [0], [1], [0, 0, 1, 1], [], []>} : vector<2x16xf32>, vector<16x128xf32>, vector<2x128xf32> -> vector<2x128xf32>
    %400 = arith.addf %399, %377 : vector<2x128xf32>
    %c1_124 = arith.constant 1 : index
    %c0_125 = arith.constant 0 : index
    %c0_126 = arith.constant 0 : index
    %401 = vector.load %arg15[%c1_124, %c0_125, %c0_126] : memref<8x2x128xf32, #tpu.memory_space<vmem>>, vector<1x2x128xf32>
    %402 = vector.shape_cast %401 : vector<1x2x128xf32> to vector<2x128xf32>
    %403 = vector.shape_cast %400 : vector<2x128xf32> to vector<1x2x128xf32>
    tpu.vector_store %arg15[%c1_124, %c0_125, %c0_126], %403 {strides = array<i32>} : memref<8x2x128xf32, #tpu.memory_space<vmem>>, vector<1x2x128xf32>,
    %cst_127 = arith.constant dense<0.000000e+00> : vector<2x16xf32>
    %404 = tpu.matmul %269, %366, %cst_127 {dimension_numbers = #tpu.dot_dimension_numbers<[1], [0], [0], [1], [0, 0, 1, 1], [], []>} : vector<2x32xf32>, vector<32x16xf32>, vector<2x16xf32> -> vector<2x16xf32>
    %405 = arith.addf %404, %369 : vector<2x16xf32>
    %cst_128 = arith.constant 0.000000e+00 : f32
    %406 = vector.broadcast %cst_128 : f32 to vector<2x16xf32>
    %407 = arith.maximumf %405, %406 : vector<2x16xf32>
    %cst_129 = arith.constant dense<0.000000e+00> : vector<2x16xf32>
    %408 = tpu.matmul %407, %370, %cst_129 {dimension_numbers = #tpu.dot_dimension_numbers<[1], [0], [0], [1], [0, 0, 1, 1], [], []>} : vector<2x16xf32>, vector<16x16xf32>, vector<2x16xf32> -> vector<2x16xf32>
    %409 = arith.addf %408, %373 : vector<2x16xf32>
    %cst_130 = arith.constant 0.000000e+00 : f32
    %410 = vector.broadcast %cst_130 : f32 to vector<2x16xf32>
    %411 = arith.maximumf %409, %410 : vector<2x16xf32>
    %cst_131 = arith.constant dense<0.000000e+00> : vector<2x128xf32>
    %412 = tpu.matmul %411, %374, %cst_131 {dimension_numbers = #tpu.dot_dimension_numbers<[1], [0], [0], [1], [0, 0, 1, 1], [], []>} : vector<2x16xf32>, vector<16x128xf32>, vector<2x128xf32> -> vector<2x128xf32>
    %413 = arith.addf %412, %377 : vector<2x128xf32>
    %c2_132 = arith.constant 2 : index
    %c0_133 = arith.constant 0 : index
    %c0_134 = arith.constant 0 : index
    %414 = vector.load %arg15[%c2_132, %c0_133, %c0_134] : memref<8x2x128xf32, #tpu.memory_space<vmem>>, vector<1x2x128xf32>
    %415 = vector.shape_cast %414 : vector<1x2x128xf32> to vector<2x128xf32>
    %416 = vector.shape_cast %413 : vector<2x128xf32> to vector<1x2x128xf32>
    tpu.vector_store %arg15[%c2_132, %c0_133, %c0_134], %416 {strides = array<i32>} : memref<8x2x128xf32, #tpu.memory_space<vmem>>, vector<1x2x128xf32>,
    %cst_135 = arith.constant dense<0.000000e+00> : vector<2x16xf32>
    %417 = tpu.matmul %287, %366, %cst_135 {dimension_numbers = #tpu.dot_dimension_numbers<[1], [0], [0], [1], [0, 0, 1, 1], [], []>} : vector<2x32xf32>, vector<32x16xf32>, vector<2x16xf32> -> vector<2x16xf32>
    %418 = arith.addf %417, %369 : vector<2x16xf32>
    %cst_136 = arith.constant 0.000000e+00 : f32
    %419 = vector.broadcast %cst_136 : f32 to vector<2x16xf32>
    %420 = arith.maximumf %418, %419 : vector<2x16xf32>
    %cst_137 = arith.constant dense<0.000000e+00> : vector<2x16xf32>
    %421 = tpu.matmul %420, %370, %cst_137 {dimension_numbers = #tpu.dot_dimension_numbers<[1], [0], [0], [1], [0, 0, 1, 1], [], []>} : vector<2x16xf32>, vector<16x16xf32>, vector<2x16xf32> -> vector<2x16xf32>
    %422 = arith.addf %421, %373 : vector<2x16xf32>
    %cst_138 = arith.constant 0.000000e+00 : f32
    %423 = vector.broadcast %cst_138 : f32 to vector<2x16xf32>
    %424 = arith.maximumf %422, %423 : vector<2x16xf32>
    %cst_139 = arith.constant dense<0.000000e+00> : vector<2x128xf32>
    %425 = tpu.matmul %424, %374, %cst_139 {dimension_numbers = #tpu.dot_dimension_numbers<[1], [0], [0], [1], [0, 0, 1, 1], [], []>} : vector<2x16xf32>, vector<16x128xf32>, vector<2x128xf32> -> vector<2x128xf32>
    %426 = arith.addf %425, %377 : vector<2x128xf32>
    %c3_140 = arith.constant 3 : index
    %c0_141 = arith.constant 0 : index
    %c0_142 = arith.constant 0 : index
    %427 = vector.load %arg15[%c3_140, %c0_141, %c0_142] : memref<8x2x128xf32, #tpu.memory_space<vmem>>, vector<1x2x128xf32>
    %428 = vector.shape_cast %427 : vector<1x2x128xf32> to vector<2x128xf32>
    %429 = vector.shape_cast %426 : vector<2x128xf32> to vector<1x2x128xf32>
    tpu.vector_store %arg15[%c3_140, %c0_141, %c0_142], %429 {strides = array<i32>} : memref<8x2x128xf32, #tpu.memory_space<vmem>>, vector<1x2x128xf32>,
    %cst_143 = arith.constant dense<0.000000e+00> : vector<2x16xf32>
    %430 = tpu.matmul %305, %366, %cst_143 {dimension_numbers = #tpu.dot_dimension_numbers<[1], [0], [0], [1], [0, 0, 1, 1], [], []>} : vector<2x32xf32>, vector<32x16xf32>, vector<2x16xf32> -> vector<2x16xf32>
    %431 = arith.addf %430, %369 : vector<2x16xf32>
    %cst_144 = arith.constant 0.000000e+00 : f32
    %432 = vector.broadcast %cst_144 : f32 to vector<2x16xf32>
    %433 = arith.maximumf %431, %432 : vector<2x16xf32>
    %cst_145 = arith.constant dense<0.000000e+00> : vector<2x16xf32>
    %434 = tpu.matmul %433, %370, %cst_145 {dimension_numbers = #tpu.dot_dimension_numbers<[1], [0], [0], [1], [0, 0, 1, 1], [], []>} : vector<2x16xf32>, vector<16x16xf32>, vector<2x16xf32> -> vector<2x16xf32>
    %435 = arith.addf %434, %373 : vector<2x16xf32>
    %cst_146 = arith.constant 0.000000e+00 : f32
    %436 = vector.broadcast %cst_146 : f32 to vector<2x16xf32>
    %437 = arith.maximumf %435, %436 : vector<2x16xf32>
    %cst_147 = arith.constant dense<0.000000e+00> : vector<2x128xf32>
    %438 = tpu.matmul %437, %374, %cst_147 {dimension_numbers = #tpu.dot_dimension_numbers<[1], [0], [0], [1], [0, 0, 1, 1], [], []>} : vector<2x16xf32>, vector<16x128xf32>, vector<2x128xf32> -> vector<2x128xf32>
    %439 = arith.addf %438, %377 : vector<2x128xf32>
    %c4_148 = arith.constant 4 : index
    %c0_149 = arith.constant 0 : index
    %c0_150 = arith.constant 0 : index
    %440 = vector.load %arg15[%c4_148, %c0_149, %c0_150] : memref<8x2x128xf32, #tpu.memory_space<vmem>>, vector<1x2x128xf32>
    %441 = vector.shape_cast %440 : vector<1x2x128xf32> to vector<2x128xf32>
    %442 = vector.shape_cast %439 : vector<2x128xf32> to vector<1x2x128xf32>
    tpu.vector_store %arg15[%c4_148, %c0_149, %c0_150], %442 {strides = array<i32>} : memref<8x2x128xf32, #tpu.memory_space<vmem>>, vector<1x2x128xf32>,
    %cst_151 = arith.constant dense<0.000000e+00> : vector<2x16xf32>
    %443 = tpu.matmul %323, %366, %cst_151 {dimension_numbers = #tpu.dot_dimension_numbers<[1], [0], [0], [1], [0, 0, 1, 1], [], []>} : vector<2x32xf32>, vector<32x16xf32>, vector<2x16xf32> -> vector<2x16xf32>
    %444 = arith.addf %443, %369 : vector<2x16xf32>
    %cst_152 = arith.constant 0.000000e+00 : f32
    %445 = vector.broadcast %cst_152 : f32 to vector<2x16xf32>
    %446 = arith.maximumf %444, %445 : vector<2x16xf32>
    %cst_153 = arith.constant dense<0.000000e+00> : vector<2x16xf32>
    %447 = tpu.matmul %446, %370, %cst_153 {dimension_numbers = #tpu.dot_dimension_numbers<[1], [0], [0], [1], [0, 0, 1, 1], [], []>} : vector<2x16xf32>, vector<16x16xf32>, vector<2x16xf32> -> vector<2x16xf32>
    %448 = arith.addf %447, %373 : vector<2x16xf32>
    %cst_154 = arith.constant 0.000000e+00 : f32
    %449 = vector.broadcast %cst_154 : f32 to vector<2x16xf32>
    %450 = arith.maximumf %448, %449 : vector<2x16xf32>
    %cst_155 = arith.constant dense<0.000000e+00> : vector<2x128xf32>
    %451 = tpu.matmul %450, %374, %cst_155 {dimension_numbers = #tpu.dot_dimension_numbers<[1], [0], [0], [1], [0, 0, 1, 1], [], []>} : vector<2x16xf32>, vector<16x128xf32>, vector<2x128xf32> -> vector<2x128xf32>
    %452 = arith.addf %451, %377 : vector<2x128xf32>
    %c5_156 = arith.constant 5 : index
    %c0_157 = arith.constant 0 : index
    %c0_158 = arith.constant 0 : index
    %453 = vector.load %arg15[%c5_156, %c0_157, %c0_158] : memref<8x2x128xf32, #tpu.memory_space<vmem>>, vector<1x2x128xf32>
    %454 = vector.shape_cast %453 : vector<1x2x128xf32> to vector<2x128xf32>
    %455 = vector.shape_cast %452 : vector<2x128xf32> to vector<1x2x128xf32>
    tpu.vector_store %arg15[%c5_156, %c0_157, %c0_158], %455 {strides = array<i32>} : memref<8x2x128xf32, #tpu.memory_space<vmem>>, vector<1x2x128xf32>,
    %cst_159 = arith.constant dense<0.000000e+00> : vector<2x16xf32>
    %456 = tpu.matmul %341, %366, %cst_159 {dimension_numbers = #tpu.dot_dimension_numbers<[1], [0], [0], [1], [0, 0, 1, 1], [], []>} : vector<2x32xf32>, vector<32x16xf32>, vector<2x16xf32> -> vector<2x16xf32>
    %457 = arith.addf %456, %369 : vector<2x16xf32>
    %cst_160 = arith.constant 0.000000e+00 : f32
    %458 = vector.broadcast %cst_160 : f32 to vector<2x16xf32>
    %459 = arith.maximumf %457, %458 : vector<2x16xf32>
    %cst_161 = arith.constant dense<0.000000e+00> : vector<2x16xf32>
    %460 = tpu.matmul %459, %370, %cst_161 {dimension_numbers = #tpu.dot_dimension_numbers<[1], [0], [0], [1], [0, 0, 1, 1], [], []>} : vector<2x16xf32>, vector<16x16xf32>, vector<2x16xf32> -> vector<2x16xf32>
    %461 = arith.addf %460, %373 : vector<2x16xf32>
    %cst_162 = arith.constant 0.000000e+00 : f32
    %462 = vector.broadcast %cst_162 : f32 to vector<2x16xf32>
    %463 = arith.maximumf %461, %462 : vector<2x16xf32>
    %cst_163 = arith.constant dense<0.000000e+00> : vector<2x128xf32>
    %464 = tpu.matmul %463, %374, %cst_163 {dimension_numbers = #tpu.dot_dimension_numbers<[1], [0], [0], [1], [0, 0, 1, 1], [], []>} : vector<2x16xf32>, vector<16x128xf32>, vector<2x128xf32> -> vector<2x128xf32>
    %465 = arith.addf %464, %377 : vector<2x128xf32>
    %c6_164 = arith.constant 6 : index
    %c0_165 = arith.constant 0 : index
    %c0_166 = arith.constant 0 : index
    %466 = vector.load %arg15[%c6_164, %c0_165, %c0_166] : memref<8x2x128xf32, #tpu.memory_space<vmem>>, vector<1x2x128xf32>
    %467 = vector.shape_cast %466 : vector<1x2x128xf32> to vector<2x128xf32>
    %468 = vector.shape_cast %465 : vector<2x128xf32> to vector<1x2x128xf32>
    tpu.vector_store %arg15[%c6_164, %c0_165, %c0_166], %468 {strides = array<i32>} : memref<8x2x128xf32, #tpu.memory_space<vmem>>, vector<1x2x128xf32>,
    %cst_167 = arith.constant dense<0.000000e+00> : vector<2x16xf32>
    %469 = tpu.matmul %359, %366, %cst_167 {dimension_numbers = #tpu.dot_dimension_numbers<[1], [0], [0], [1], [0, 0, 1, 1], [], []>} : vector<2x32xf32>, vector<32x16xf32>, vector<2x16xf32> -> vector<2x16xf32>
    %470 = arith.addf %469, %369 : vector<2x16xf32>
    %cst_168 = arith.constant 0.000000e+00 : f32
    %471 = vector.broadcast %cst_168 : f32 to vector<2x16xf32>
    %472 = arith.maximumf %470, %471 : vector<2x16xf32>
    %cst_169 = arith.constant dense<0.000000e+00> : vector<2x16xf32>
    %473 = tpu.matmul %472, %370, %cst_169 {dimension_numbers = #tpu.dot_dimension_numbers<[1], [0], [0], [1], [0, 0, 1, 1], [], []>} : vector<2x16xf32>, vector<16x16xf32>, vector<2x16xf32> -> vector<2x16xf32>
    %474 = arith.addf %473, %373 : vector<2x16xf32>
    %cst_170 = arith.constant 0.000000e+00 : f32
    %475 = vector.broadcast %cst_170 : f32 to vector<2x16xf32>
    %476 = arith.maximumf %474, %475 : vector<2x16xf32>
    %cst_171 = arith.constant dense<0.000000e+00> : vector<2x128xf32>
    %477 = tpu.matmul %476, %374, %cst_171 {dimension_numbers = #tpu.dot_dimension_numbers<[1], [0], [0], [1], [0, 0, 1, 1], [], []>} : vector<2x16xf32>, vector<16x128xf32>, vector<2x128xf32> -> vector<2x128xf32>
    %478 = arith.addf %477, %377 : vector<2x128xf32>
    %c7_172 = arith.constant 7 : index
    %c0_173 = arith.constant 0 : index
    %c0_174 = arith.constant 0 : index
    %479 = vector.load %arg15[%c7_172, %c0_173, %c0_174] : memref<8x2x128xf32, #tpu.memory_space<vmem>>, vector<1x2x128xf32>
    %480 = vector.shape_cast %479 : vector<1x2x128xf32> to vector<2x128xf32>
    %481 = vector.shape_cast %478 : vector<2x128xf32> to vector<1x2x128xf32>
    tpu.vector_store %arg15[%c7_172, %c0_173, %c0_174], %481 {strides = array<i32>} : memref<8x2x128xf32, #tpu.memory_space<vmem>>, vector<1x2x128xf32>,
    return
  }
}

</mosaic_0001>

<bundles_post_ra>
// kernel: tpu_custom_call.1
= control target key start
LH: loop header
LB: loop body
LE: loop exit
PB: predicated region body
PF: predicated region fallthrough
CT: control target
= control target key end

     0   :  { %s3404_s0 = inlined_call_operand.vmem [shape: f32[8,2,4], index: 0, kind: input, shape index: {}]   ;;  %s3405_s1 = inlined_call_operand.hbm [shape: f32[2,2,32], index: 1, kind: input, shape index: {}]   ;;  %s3406_s2 = inlined_call_operand.hbm [shape: f32[2,2,32], index: 2, kind: input, shape index: {}]   ;;  %s3407_s3 = inlined_call_operand.hbm [shape: f32[4,128], index: 3, kind: input, shape index: {}]   ;;  %s3408_s4 = inlined_call_operand.vmem [shape: f32[32,128], index: 4, kind: input, shape index: {}]   ;;  %s3409_s5 = inlined_call_operand.hbm [shape: f32[1,128], index: 5, kind: input, shape index: {}]   ;;  %s3410_s6 = inlined_call_operand.hbm [shape: f32[32,128], index: 6, kind: input, shape index: {}]   ;;  %s3411_s7 = inlined_call_operand.hbm [shape: f32[32,128], index: 7, kind: input, shape index: {}]   ;;  %s3412_s8 = inlined_call_operand.hbm [shape: f32[1,128], index: 8, kind: input, shape index: {}]   ;;  %s3413_s9 = inlined_call_operand.vmem [shape: f32[32,16], index: 9, kind: input, shape index: {}]   ;;  %s3414_s10 = inlined_call_operand.vmem [shape: f32[1,16], index: 10, kind: input, shape index: {}]   ;;  %s3415_s11 = inlined_call_operand.vmem [shape: f32[16,16], index: 11, kind: input, shape index: {}]   ;;  %s3416_s12 = inlined_call_operand.vmem [shape: f32[1,16], index: 12, kind: input, shape index: {}]   ;;  %s3417_s13 = inlined_call_operand.vmem [shape: f32[16,128], index: 13, kind: input, shape index: {}]   ;;  %s3418_s14 = inlined_call_operand.vmem [shape: f32[1,128], index: 14, kind: input, shape index: {}]   ;;  %s3419_s15 = inlined_call_operand.hbm [shape: f32[8,2,128], index: 15, kind: output, shape index: {0}]   ;;  %s3420_s16 = inlined_call_operand.hbm [shape: f32[2,2,32], index: 16, kind: output, shape index: {1}]   ;;  %s3421_s17 = inlined_call_operand.hbm [shape: f32[2,2,32], index: 17, kind: output, shape index: {2}]  }
   0x1   :  { %3423 = sst [smem:[#allocation24_spill]] %s3404_s0 }
   0x2   :  { %3424 = sst [smem:[#allocation25_spill]] %s3405_s1 }
   0x3   :  { %3425 = sst [smem:[#allocation26_spill]] %s3419_s15 }
   0x4   :  { %23 = vsyncpa [#allocation3], 0 }
   0x5   :  { %24 = vsyncpa [#allocation6], 0 }
   0x6   :  { %25 = vsyncpa [#allocation9], 0 }
   0x7   :  { %26 = vsyncpa [#allocation12], 0 }
   0x8   :  { %27 = vsyncpa [#allocation4], 0 }
   0x9   :  { %28 = vsyncpa [#allocation16], 0  ;;  %s48_s26 = sshll.u32 %s3406_s2, 4  ;;  %s2698_s27 = smov [#allocation5]   ;;  %s49_s26 = int_to_ptr.hbm [resolvable:$true] %s48_s26 }
   0xa   :  { %s50_s28 = sshll.u32 %s2698_s27, 4  ;;  %s75_s30 = sshll.u32 %s3409_s5, 4  ;;  %s51_s28 = int_to_ptr.vmem [resolvable:$true] %s50_s28  ;;  %s76_s30 = int_to_ptr.hbm [resolvable:$true] %s75_s30 }
   0xb   :  { %s2699_s18 = smov 32   ;;  %s2700_s19 = smov 2  }
   0xc   :  { %56 = dma.hbm_to_vmem [thread:$0]  %s49_s26, 64, %s51_s28, [#allocation6], %s2699_s18, %s2699_s18, %s2700_s19  }
   0xd   :  { %s2701_s1 = smov [#allocation8]   ;;  %s98_s22 = sshll.u32 %s3411_s7, 4  ;;  %s99_s22 = int_to_ptr.hbm [resolvable:$true] %s98_s22 }
   0xe   :  { %s77_s20 = sshll.u32 %s2701_s1, 4  ;;  %s2702_s23 = smov [#allocation11]   ;;  %s78_s20 = int_to_ptr.vmem [resolvable:$true] %s77_s20 }
   0xf   :  { %80 = dma.hbm_to_vmem [thread:$0]  %s76_s30, 16, %s78_s20, [#allocation9]  }
  0x10   :  { %s100_s24 = sshll.u32 %s2702_s23, 4  ;;  %s3426_s27 = sld [smem:[#allocation25_spill]]  ;;  %s101_s24 = int_to_ptr.vmem [resolvable:$true] %s100_s24 }
  0x11   :  { %s2703_s0 = smov 128   ;;  %s2704_s15 = smov 8  }
  0x12   :  { %106 = dma.hbm_to_vmem [thread:$0]  %s99_s22, 512, %s101_s24, [#allocation12], %s2703_s0, %s2703_s0, %s2704_s15  }
  0x13   :  { %s2705_s26 = smov [#allocation2]   ;;  %s62_s20 = sshll.u32 %s3407_s3, 4  ;;  %s63_s20 = int_to_ptr.hbm [resolvable:$true] %s62_s20 }
  0x14   :  { %s37_s28 = sshll.u32 %s2705_s26, 4  ;;  %s85_s21 = sshll.u32 %s3410_s6, 4  ;;  %s38_s28 = int_to_ptr.vmem [resolvable:$true] %s37_s28  ;;  %s86_s21 = int_to_ptr.hbm [resolvable:$true] %s85_s21 }
  0x15   :  { %s2706_s23 = smov [#allocation7]   ;;  %s2707_s22 = smov [#allocation10]  }
  0x16   :  { %s35_s29 = sshll.u32 %s3426_s27, 4  ;;  %s64_s5 = sshll.u32 %s2706_s23, 4  ;;  %s36_s29 = int_to_ptr.hbm [resolvable:$true] %s35_s29  ;;  %s65_s5 = int_to_ptr.vmem [resolvable:$true] %s64_s5 }
  0x17   :  { %43 = dma.hbm_to_vmem [thread:$0]  %s36_s29, 64, %s38_s28, [#allocation3], %s2699_s18, %s2699_s18, %s2700_s19  }
  0x18   :  { %67 = dma.hbm_to_vmem [thread:$0]  %s63_s20, 64, %s65_s5, [#allocation6]  }
  0x19   :  { %s87_s24 = sshll.u32 %s2707_s22, 4  ;;  %s112_s3 = sshll.u32 %s3412_s8, 4  ;;  %s88_s24 = int_to_ptr.vmem [resolvable:$true] %s87_s24  ;;  %s113_s3 = int_to_ptr.hbm [resolvable:$true] %s112_s3 }
  0x1a   :  { %93 = dma.hbm_to_vmem [thread:$0]  %s86_s21, 512, %s88_s24, [#allocation9], %s2703_s0, %s2703_s0, %s2704_s15  }
  0x1b   :  { %s2708_s26 = smov [#allocation13]  }
  0x1c   :  { %s114_s29 = sshll.u32 %s2708_s26, 4  ;;  %s115_s29 = int_to_ptr.vmem [resolvable:$true] %s114_s29 }
  0x1d   :  { %117 = dma.hbm_to_vmem [thread:$0]  %s113_s3, 16, %s115_s29, [#allocation12]  }
  0x1e   :  { %2686 = dma.done.wait [#allocation3], 64  }
  0x1f   :  { %2687 = vsyncadd [#allocation3], 4294967232 }
  0x20   :  { %2688 = dma.done.wait [#allocation6], 128  }
  0x21   :  { %2689 = vsyncadd [#allocation6], 4294967168 }
  0x22   :  { %2690 = dma.done.wait [#allocation9], 528  }
  0x23   :  { %2691 = vsyncadd [#allocation9], 4294966768 }
  0x24   :  { %2692 = dma.done.wait [#allocation12], 528  }
  0x25   :  { %2693 = vsyncadd [#allocation12], 4294966768  ;;  %vm186_vm0 = vcmask 1043456   ;;  %vm182_vm1 = vcmask 31744   ;;  %v173_v0 = vld [vmem:[#allocation7] sm:$0xf] }
  0x26   :  { %s3427_s28 = sld [smem:[#allocation24_spill]]  ;;  %2217 = vmatpush.msk.msra.mxu0 %vm186_vm0, %v173_v0  ;;  %v2838_v2 = vld [vmem:[%s3408_s4 + $0x18] sm:$0xff]  ;;  %2219 = vmatpush.msk.msra.mxu1 %vm186_vm0, %v173_v0  ;;  %v2847_v3 = vld [vmem:[%s3408_s4 + $0x10] sm:$0xff]  ;;  %v2855_v4 = vld [vmem:[%s3408_s4 + $0x8] sm:$0xff]  ;;  %vm373_vm2 = vcmask 261120   ;;  %s2709_s27 = smov 64  }
  0x27   :  { %2221 = vmatpush.msk.msra.mxu2 %vm186_vm0, %v173_v0  ;;  %2223 = vmatpush.msk.msra.mxu3 %vm186_vm0, %v173_v0  ;;  %v2867_v6 = vld [vmem:[%s3408_s4] sm:$0xff]  ;;  %v371_v7 = vld [vmem:[#allocation2] sm:$0x3]  ;;  %v2878_v10 = vld [vmem:[#allocation8] ss:$0 sm:$0xff]  ;;  %s2712_s30 = smov [#allocation17]  }
  0x28   :  { %2227 = vmatpush.msk.msrb.mxu1 %vm186_vm0, %v173_v0  ;;  %2225 = vmatpush.msk.msrb.mxu0 %vm186_vm0, %v173_v0  ;;  %v372_v15 = vld [vmem:[#allocation5] sm:$0x3]  ;;  %s2183_s20 = sshll.u32 %s2712_s30, 4  ;;  %s2185_s21 = sshll.u32 %s3421_s17, 4  ;;  %s2184_s20 = int_to_ptr.vmem [resolvable:$true] %s2183_s20  ;;  %s2186_s21 = int_to_ptr.hbm [resolvable:$true] %s2185_s21 }
  0x29   :  { %2229 = vmatpush.msk.msrb.mxu2 %vm186_vm0, %v173_v0  ;;  %2231 = vmatpush.msk.msrb.mxu3 %vm186_vm0, %v173_v0  ;;  %s2713_s23 = smov [#allocation14]   ;;  %s3428_s4 = sld [smem:[#allocation26_spill]] }
  0x2c   :  { %v158_v1 = vld [vmem:[%s3427_s28] sm:$0x3]  ;;  %v2213_v5 = vld [vmem:[%s3427_s28 + $0x8] sm:$0x3]  ;;  %v2210_v36 = vld [vmem:[%s3427_s28 + $0x2] sm:$0x3] }
  0x2d   :  { %2218 = vmatmul.msk.f32.vlgmr.msra.gmra.mxu0 %vm182_vm1, %v158_v1  ;;  %2220 = vmatmul.msk.f32.vlgmr.msra.gmra.mxu1 %vm182_vm1, %v2210_v36  ;;  %v2214_v37 = vld [vmem:[%s3427_s28 + $0xa] sm:$0x3] }
  0x2e   :  { %389 = vmatpush.msra.mxu0 %v2838_v2  ;;  %455 = vmatpush.msra.mxu1 %v2838_v2 }
  0x2f   :  { %s2159_s22 = sshll.u32 %s3428_s4, 4  ;;  %s2160_s22 = int_to_ptr.hbm [resolvable:$true] %s2159_s22 }
  0x30   :  { %390 = vmatpush.msra.mxu0 %v2847_v3  ;;  %456 = vmatpush.msra.mxu1 %v2847_v3 }
  0x32   :  { %391 = vmatpush.msra.mxu0 %v2855_v4  ;;  %457 = vmatpush.msra.mxu1 %v2855_v4 }
  0x34   :  { %392 = vmatpush.msra.mxu0 %v2867_v6  ;;  %458 = vmatpush.msra.mxu1 %v2867_v6 }
  0x35   :  { %2226 = vmatmul.msk.f32.vlgmr.msrb.gmra.mxu0 %vm182_vm1, %v2213_v5  ;;  %2228 = vmatmul.msk.f32.vlgmr.msrb.gmra.mxu1 %vm182_vm1, %v2214_v37  ;;  %v2211_v5 = vld [vmem:[%s3427_s28 + $0x4] sm:$0x3] }
  0x36   :  { %641 = vmatpush.msrb.mxu0 %v2838_v2  ;;  %703 = vmatpush.msrb.mxu1 %v2838_v2 }
  0x37   :  { %2222 = vmatmul.msk.f32.vlgmr.msra.gmra.mxu2 %vm182_vm1, %v2211_v5 }
  0x38   :  { %642 = vmatpush.msrb.mxu0 %v2847_v3  ;;  %704 = vmatpush.msrb.mxu1 %v2847_v3 }
  0x39   :  { %517 = vmatpush.msra.mxu2 %v2838_v2 }
  0x3a   :  { %643 = vmatpush.msrb.mxu0 %v2855_v4  ;;  %705 = vmatpush.msrb.mxu1 %v2855_v4 }
  0x3b   :  { %518 = vmatpush.msra.mxu2 %v2847_v3 }
  0x3c   :  { %644 = vmatpush.msrb.mxu0 %v2867_v6  ;;  %706 = vmatpush.msrb.mxu1 %v2867_v6 }
  0x3d   :  { %2233 = vmatmul.msk.f32.vlgmr.msra.gmra.mxu0 %vm373_vm2, %v371_v7  ;;  %v2215_v7 = vld [vmem:[%s3427_s28 + $0xc] sm:$0x3]  ;;  %519 = vmatpush.msra.mxu2 %v2855_v4 }
  0x3f   :  { %520 = vmatpush.msra.mxu2 %v2867_v6 }
  0x40   :  { %2230 = vmatmul.msk.f32.vlgmr.msrb.gmra.mxu2 %vm182_vm1, %v2215_v7 }
  0x41   :  { %765 = vmatpush.msrb.mxu2 %v2838_v2 }
  0x43   :  { %766 = vmatpush.msrb.mxu2 %v2847_v3 }
  0x45   :  { %767 = vmatpush.msrb.mxu2 %v2855_v4 }
  0x47   :  { %768 = vmatpush.msrb.mxu2 %v2867_v6 }
  0xaa   :  { %v207_v8 = vpop.f32.mrf.mxu0  ;;  %v230_v41 = vpop.f32.mrf.mxu1 }
  0xab   :  { %v208_v11 = vadd.f32 %v2878_v10, %v207_v8  ;;  %v231_v43 = vadd.f32 %v2878_v10, %v230_v41 }
  0xb2   :  { %v2876_v9 = vpop.f32.mrf.mxu0  ;;  %v2906_v42 = vpop.f32.mrf.mxu1 }
  0xba   :  { %v394_v12 = vpop.f32.mrf.mxu0 }
  0xbb   :  { %v395_v13 = vadd.f32 %v394_v12, %v208_v11 }
  0xbd   :  { %2318 = vtanh.f32 %v395_v13  ;;  %v2234_v16 = vmul.f32 -1.442695, %v395_v13  ;;  %v253_v13 = vpop.f32.mrf.mxu2 }
  0xbf   :  { %2320 = vpow2.f32 %v2234_v16 }
  0xc3   :  { %v2319_v14 = vpop.eup %2318 }
  0xc4   :  { %423 = vrot.lane.b32.xlu0 %v2319_v14, %s2699_s18 }
  0xc5   :  { %v2321_v17 = vpop.eup %2320  ;;  %v2933_v14 = vpop.f32.mrf.mxu2 }
  0xc6   :  { %v400_v18 = vadd.f32 1.0, %v2321_v17 }
  0xc8   :  { %2322 = vrcp.f32 %v400_v18  ;;  %v412_v24 = vand.u32 2147483648, %v400_v18  ;;  %vm406_vm4 = vweird.f32 %v400_v18  ;;  %v410_v25 = vand.u32 2147483647, %v400_v18 }
  0xca   :  { %v413_v27 = vor.u32 1.1754944e-38, %v412_v24  ;;  %vm411_vm6 = vcmp.eq.f32.partialorder %v410_v25, 8.507059e+37 }
  0xcc   :  { %418 = vrot.lane.b32.xlu0 %v372_v15, %s2699_s18  ;;  %v254_v15 = vadd.f32 %v2878_v10, %v253_v13  ;;  %v2973_v13 = vld [vmem:[#allocation10 + $0x8] sm:$0xff] }
  0xce   :  { %v2323_v19 = vpop.eup %2322 }
  0xcf   :  { %v402_v20 = vmul.f32 %v2323_v19, %v400_v18  ;;  %vm407_vm3 = vweird.f32 %v2323_v19 }
  0xd0   :  { %vm408_vm5 = vmor %vm406_vm4, %vm407_vm3 }
  0xd1   :  { %v403_v21 = vsub.f32 1.0, %v402_v20 }
  0xd3   :  { %v404_v22 = vmul.f32 %v2323_v19, %v403_v21 }
  0xd5   :  { %v405_v23 = vadd.f32 %v2323_v19, %v404_v22 }
  0xd7   :  { %v409_v26 = vsel %vm408_vm5, %v2323_v19, %v405_v23 }
  0xd8   :  { %v414_v29 = vsel %vm411_vm6, %v413_v27, %v409_v26 }
 0x136   :  { %v424_v28 = vpop.permute.xlu0 %423 }
 0x137   :  { %v426_v30 = vmul.f32 %v424_v28, %v414_v29 }
 0x139   :  { %428 = vrot.lane.b32.xlu1 %v426_v30, %s2699_s18 }
 0x13e   :  { %v419_v31 = vpop.permute.xlu0 %418 }
 0x13f   :  { %v421_v32 = vmul.f32 %v419_v31, %v414_v29 }
 0x1ab   :  { %v429_v33 = vpop.permute.xlu1 %428 }
 0x1ac   :  { %v431_v34 = vadd.f32 %v429_v33, %v421_v32 }
 0x1ae   :  { %2324 = vtanh.f32 %v431_v34 }
 0x1b4   :  { %v2325_v35 = vpop.eup %2324 }
 0x1b5   :  { %434 = vrot.lane.b32.xlu1 %v2325_v35, %s2699_s18 }
 0x227   :  { %v435_v38 = vpop.permute.xlu1 %434 }
 0x228   :  { %v437_v39 = vmul.f32 %v435_v38, %v414_v29  ;;  %v2212_v38 = vld [vmem:[%s3427_s28 + $0x6] sm:$0x3] }
 0x229   :  { %2224 = vmatmul.msk.f32.vlgmr.msra.gmra.mxu3 %vm182_vm1, %v2212_v38 }
 0x22a   :  { %439 = vrot.lane.b32.xlu2 %v437_v39, %s2709_s27  ;;  %579 = vmatpush.msra.mxu3 %v2838_v2  ;;  %v2216_v39 = vld [vmem:[%s3427_s28 + $0xe] sm:$0x3]  ;;  %s2172_s28 = sshll.u32 %s3420_s16, 4  ;;  %s2157_s16 = sshll.u32 %s2713_s23, 4  ;;  %s2173_s28 = int_to_ptr.hbm [resolvable:$true] %s2172_s28  ;;  %s2158_s16 = int_to_ptr.vmem [resolvable:$true] %s2157_s16 }
 0x22c   :  { %580 = vmatpush.msra.mxu3 %v2847_v3 }
 0x22e   :  { %581 = vmatpush.msra.mxu3 %v2855_v4 }
 0x230   :  { %582 = vmatpush.msra.mxu3 %v2867_v6 }
 0x231   :  { %2232 = vmatmul.msk.f32.vlgmr.msrb.gmra.mxu3 %vm182_vm1, %v2216_v39 }
 0x232   :  { %827 = vmatpush.msrb.mxu3 %v2838_v2 }
 0x234   :  { %828 = vmatpush.msrb.mxu3 %v2847_v3 }
 0x236   :  { %829 = vmatpush.msrb.mxu3 %v2855_v4 }
 0x238   :  { %830 = vmatpush.msrb.mxu3 %v2867_v6 }
 0x284   :  { %v2902_v40 = vpop.permute.xlu2 %439 }
 0x285   :  { %2235 = vmatmul.msk.f32.vlgmr.msra.gmra.mxu1 %vm373_vm2, %v2902_v40 }
 0x302   :  { %v460_v44 = vpop.f32.mrf.mxu1 }
 0x303   :  { %v461_v45 = vadd.f32 %v460_v44, %v231_v43 }
 0x305   :  { %2326 = vtanh.f32 %v461_v45  ;;  %v2236_v47 = vmul.f32 -1.442695, %v461_v45  ;;  %v276_v45 = vpop.f32.mrf.mxu3 }
 0x306   :  { %v277_v2 = vadd.f32 %v2878_v10, %v276_v45  ;;  %v3015_v45 = vld [vmem:[#allocation11 + $0x8] sm:$0xff] }
 0x307   :  { %2328 = vpow2.f32 %v2236_v47 }
 0x30b   :  { %v2327_v46 = vpop.eup %2326 }
 0x30c   :  { %485 = vrot.lane.b32.xlu2 %v2327_v46, %s2699_s18 }
 0x30d   :  { %v2329_v48 = vpop.eup %2328  ;;  %v2960_v46 = vpop.f32.mrf.mxu3 }
 0x30e   :  { %v466_v49 = vadd.f32 1.0, %v2329_v48 }
 0x310   :  { %2330 = vrcp.f32 %v466_v49  ;;  %v478_v55 = vand.u32 2147483648, %v466_v49  ;;  %vm472_vm8 = vweird.f32 %v466_v49  ;;  %v476_v56 = vand.u32 2147483647, %v466_v49 }
 0x312   :  { %v479_v58 = vor.u32 1.1754944e-38, %v478_v55  ;;  %vm477_vm10 = vcmp.eq.f32.partialorder %v476_v56, 8.507059e+37 }
 0x316   :  { %v2331_v50 = vpop.eup %2330 }
 0x317   :  { %v468_v51 = vmul.f32 %v2331_v50, %v466_v49  ;;  %vm473_vm7 = vweird.f32 %v2331_v50 }
 0x318   :  { %vm474_vm9 = vmor %vm472_vm8, %vm473_vm7 }
 0x319   :  { %v469_v52 = vsub.f32 1.0, %v468_v51 }
 0x31b   :  { %v470_v53 = vmul.f32 %v2331_v50, %v469_v52 }
 0x31d   :  { %v471_v54 = vadd.f32 %v2331_v50, %v470_v53 }
 0x31f   :  { %v475_v57 = vsel %vm474_vm9, %v2331_v50, %v471_v54 }
 0x320   :  { %v480_v60 = vsel %vm477_vm10, %v479_v58, %v475_v57 }
 0x321   :  { %v483_v62 = vmul.f32 %v480_v60, %v431_v34 }
 0x366   :  { %v486_v59 = vpop.permute.xlu2 %485 }
 0x367   :  { %v488_v61 = vmul.f32 %v486_v59, %v480_v60 }
 0x369   :  { %490 = vrot.lane.b32.xlu0 %v488_v61, %s2699_s18 }
 0x3db   :  { %v491_v63 = vpop.permute.xlu0 %490 }
 0x3dc   :  { %v493_v0 = vadd.f32 %v491_v63, %v483_v62 }
 0x3de   :  { %2332 = vtanh.f32 %v493_v0 }
 0x3e4   :  { %v2333_v1 = vpop.eup %2332 }
 0x3e5   :  { %496 = vrot.lane.b32.xlu1 %v2333_v1, %s2699_s18 }
 0x457   :  { %v497_v8 = vpop.permute.xlu1 %496 }
 0x458   :  { %v499_v11 = vmul.f32 %v497_v8, %v480_v60  ;;  %v2967_v8 = vld [vmem:[#allocation10 + $0x18] sm:$0xff] }
 0x459   :  { %907 = vmatpush.msra.mxu0 %v2967_v8  ;;  %927 = vmatpush.msra.mxu1 %v2967_v8 }
 0x45a   :  { %501 = vrot.lane.b32.xlu2 %v499_v11, %s2709_s27  ;;  %v2969_v11 = vld [vmem:[#allocation10 + $0x10] sm:$0xff] }
 0x45b   :  { %908 = vmatpush.msra.mxu0 %v2969_v11  ;;  %928 = vmatpush.msra.mxu1 %v2969_v11 }
 0x45d   :  { %909 = vmatpush.msra.mxu0 %v2973_v13  ;;  %929 = vmatpush.msra.mxu1 %v2973_v13 }
 0x4b4   :  { %v2929_v12 = vpop.permute.xlu2 %501 }
 0x4b5   :  { %2237 = vmatmul.msk.f32.vlgmr.msra.gmra.mxu2 %vm373_vm2, %v2929_v12 }
 0x4b6   :  { %947 = vmatpush.msra.mxu2 %v2967_v8 }
 0x4b8   :  { %948 = vmatpush.msra.mxu2 %v2969_v11 }
 0x4ba   :  { %949 = vmatpush.msra.mxu2 %v2973_v13 }
 0x538   :  { %v522_v16 = vpop.f32.mrf.mxu2 }
 0x539   :  { %v523_v17 = vadd.f32 %v522_v16, %v254_v15  ;;  %v2979_v15 = vld [vmem:[#allocation10] sm:$0xff] }
 0x53a   :  { %910 = vmatpush.msra.mxu0 %v2979_v15  ;;  %930 = vmatpush.msra.mxu1 %v2979_v15 }
 0x53b   :  { %2334 = vtanh.f32 %v523_v17  ;;  %v2238_v19 = vmul.f32 -1.442695, %v523_v17  ;;  %950 = vmatpush.msra.mxu2 %v2979_v15  ;;  %v300_v17 = vadd.f32 %v2878_v10, %v2876_v9 }
 0x53d   :  { %2336 = vpow2.f32 %v2238_v19 }
 0x541   :  { %v2335_v18 = vpop.eup %2334 }
 0x542   :  { %547 = vrot.lane.b32.xlu0 %v2335_v18, %s2699_s18 }
 0x543   :  { %v2337_v20 = vpop.eup %2336 }
 0x544   :  { %v528_v21 = vadd.f32 1.0, %v2337_v20 }
 0x546   :  { %2338 = vrcp.f32 %v528_v21  ;;  %v540_v27 = vand.u32 2147483648, %v528_v21  ;;  %vm534_vm12 = vweird.f32 %v528_v21  ;;  %v538_v28 = vand.u32 2147483647, %v528_v21 }
 0x548   :  { %v541_v30 = vor.u32 1.1754944e-38, %v540_v27  ;;  %vm539_vm14 = vcmp.eq.f32.partialorder %v538_v28, 8.507059e+37 }
 0x54c   :  { %v2339_v22 = vpop.eup %2338 }
 0x54d   :  { %v530_v23 = vmul.f32 %v2339_v22, %v528_v21  ;;  %vm535_vm11 = vweird.f32 %v2339_v22 }
 0x54e   :  { %vm536_vm13 = vmor %vm534_vm12, %vm535_vm11 }
 0x54f   :  { %v531_v24 = vsub.f32 1.0, %v530_v23 }
 0x551   :  { %v532_v25 = vmul.f32 %v2339_v22, %v531_v24 }
 0x553   :  { %v533_v26 = vadd.f32 %v2339_v22, %v532_v25 }
 0x555   :  { %v537_v29 = vsel %vm536_vm13, %v2339_v22, %v533_v26 }
 0x556   :  { %v542_v32 = vsel %vm539_vm14, %v541_v30, %v537_v29 }
 0x557   :  { %v545_v34 = vmul.f32 %v542_v32, %v493_v0 }
 0x5b4   :  { %v548_v31 = vpop.permute.xlu0 %547 }
 0x5b5   :  { %v550_v33 = vmul.f32 %v548_v31, %v542_v32 }
 0x5b7   :  { %552 = vrot.lane.b32.xlu1 %v550_v33, %s2699_s18 }
 0x629   :  { %v553_v35 = vpop.permute.xlu1 %552 }
 0x62a   :  { %v555_v36 = vadd.f32 %v553_v35, %v545_v34 }
 0x62c   :  { %2340 = vtanh.f32 %v555_v36 }
 0x632   :  { %v2341_v37 = vpop.eup %2340 }
 0x633   :  { %558 = vrot.lane.b32.xlu2 %v2341_v37, %s2699_s18 }
 0x68d   :  { %v559_v41 = vpop.permute.xlu2 %558 }
 0x68e   :  { %v561_v43 = vmul.f32 %v559_v41, %v542_v32  ;;  %v3010_v41 = vld [vmem:[#allocation11 + $0x18] sm:$0xff] }
 0x690   :  { %563 = vrot.lane.b32.xlu0 %v561_v43, %s2709_s27  ;;  %v3012_v43 = vld [vmem:[#allocation11 + $0x10] sm:$0xff] }
 0x702   :  { %v2956_v44 = vpop.permute.xlu0 %563 }
 0x703   :  { %2239 = vmatmul.msk.f32.vlgmr.msra.gmra.mxu3 %vm373_vm2, %v2956_v44 }
 0x704   :  { %967 = vmatpush.msra.mxu3 %v2967_v8 }
 0x706   :  { %968 = vmatpush.msra.mxu3 %v2969_v11 }
 0x708   :  { %969 = vmatpush.msra.mxu3 %v2973_v13 }
 0x70a   :  { %970 = vmatpush.msra.mxu3 %v2979_v15 }
 0x786   :  { %v584_v47 = vpop.f32.mrf.mxu3 }
 0x787   :  { %v585_v3 = vadd.f32 %v584_v47, %v277_v2  ;;  %v3018_v2 = vld [vmem:[#allocation11] sm:$0xff] }
 0x789   :  { %2342 = vtanh.f32 %v585_v3  ;;  %v2240_v6 = vmul.f32 -1.442695, %v585_v3  ;;  %v1058_v3 = vld [vmem:[#allocation2 + $0x2] sm:$0x3] }
 0x78b   :  { %2344 = vpow2.f32 %v2240_v6  ;;  %v323_v6 = vadd.f32 %v2878_v10, %v2906_v42 }
 0x78f   :  { %v2343_v4 = vpop.eup %2342 }
 0x790   :  { %609 = vrot.lane.b32.xlu1 %v2343_v4, %s2699_s18 }
 0x791   :  { %v2345_v48 = vpop.eup %2344 }
 0x792   :  { %v590_v49 = vadd.f32 1.0, %v2345_v48 }
 0x794   :  { %2346 = vrcp.f32 %v590_v49  ;;  %v602_v55 = vand.u32 2147483648, %v590_v49  ;;  %vm596_vm0 = vweird.f32 %v590_v49  ;;  %v600_v56 = vand.u32 2147483647, %v590_v49 }
 0x796   :  { %v603_v58 = vor.u32 1.1754944e-38, %v602_v55  ;;  %vm601_vm3 = vcmp.eq.f32.partialorder %v600_v56, 8.507059e+37  ;;  %v1060_v55 = vld [vmem:[#allocation5 + $0x2] sm:$0x3] }
 0x79a   :  { %v2347_v50 = vpop.eup %2346 }
 0x79b   :  { %v592_v51 = vmul.f32 %v2347_v50, %v590_v49  ;;  %vm597_vm15 = vweird.f32 %v2347_v50 }
 0x79c   :  { %vm598_vm1 = vmor %vm596_vm0, %vm597_vm15 }
 0x79d   :  { %v593_v52 = vsub.f32 1.0, %v592_v51  ;;  %v3043_v51 = vld [vmem:[#allocation13] ss:$0 sm:$0xff] }
 0x79f   :  { %v594_v53 = vmul.f32 %v2347_v50, %v593_v52 }
 0x7a1   :  { %v595_v54 = vadd.f32 %v2347_v50, %v594_v53 }
 0x7a3   :  { %v599_v57 = vsel %vm598_vm1, %v2347_v50, %v595_v54 }
 0x7a4   :  { %v604_v60 = vsel %vm601_vm3, %v603_v58, %v599_v57 }
 0x7a5   :  { %v607_v62 = vmul.f32 %v604_v60, %v555_v36 }
 0x802   :  { %v610_v59 = vpop.permute.xlu1 %609 }
 0x803   :  { %v612_v61 = vmul.f32 %v610_v59, %v604_v60 }
 0x805   :  { %614 = vrot.lane.b32.xlu2 %v612_v61, %s2699_s18 }
 0x85f   :  { %v615_v63 = vpop.permute.xlu2 %614 }
 0x860   :  { %v617_v0 = vadd.f32 %v615_v63, %v607_v62 }
 0x862   :  { %2348 = vtanh.f32 %v617_v0 }
 0x868   :  { %v2349_v1 = vpop.eup %2348 }
 0x869   :  { %620 = vrot.lane.b32.xlu0 %v2349_v1, %s2699_s18 }
 0x8db   :  { %v621_v5 = vpop.permute.xlu0 %620 }
 0x8dc   :  { %v623_v7 = vmul.f32 %v621_v5, %v604_v60 }
 0x8de   :  { %625 = vrot.lane.b32.xlu1 %v623_v7, %s2709_s27 }
 0x950   :  { %v2991_v16 = vpop.permute.xlu1 %625 }
 0x951   :  { %2241 = vmatmul.msk.f32.vlgmr.msrb.gmra.mxu0 %vm373_vm2, %v2991_v16 }
 0x952   :  { %987 = vmatpush.msrb.mxu0 %v2967_v8 }
 0x954   :  { %988 = vmatpush.msrb.mxu0 %v2969_v11 }
 0x956   :  { %989 = vmatpush.msrb.mxu0 %v2973_v13 }
 0x958   :  { %990 = vmatpush.msrb.mxu0 %v2979_v15 }
 0x959   :  { %2249 = vmatmul.msk.f32.vlgmr.msra.gmra.mxu0 %vm373_vm2, %v2902_v40 }
 0x95a   :  { %1076 = vmatpush.msra.mxu0 %v3010_v41 }
 0x95c   :  { %1077 = vmatpush.msra.mxu0 %v3012_v43 }
 0x95e   :  { %1078 = vmatpush.msra.mxu0 %v3015_v45 }
 0x960   :  { %1079 = vmatpush.msra.mxu0 %v3018_v2 }
 0x9ce   :  { %v646_v18 = vpop.f32.mrf.mxu0 }
 0x9cf   :  { %v647_v19 = vadd.f32 %v646_v18, %v300_v17 }
 0x9d1   :  { %2350 = vtanh.f32 %v647_v19  ;;  %v2242_v21 = vmul.f32 -1.442695, %v647_v19 }
 0x9d3   :  { %2352 = vpow2.f32 %v2242_v21 }
 0x9d6   :  { %v912_v4 = vpop.f32.mrf.mxu0 }
 0x9d7   :  { %v2351_v20 = vpop.eup %2350 }
 0x9d8   :  { %671 = vrot.lane.b32.xlu2 %v2351_v20, %s2699_s18 }
 0x9d9   :  { %v2353_v22 = vpop.eup %2352 }
 0x9da   :  { %v652_v23 = vadd.f32 1.0, %v2353_v22 }
 0x9dc   :  { %2354 = vrcp.f32 %v652_v23  ;;  %v664_v40 = vand.u32 2147483648, %v652_v23  ;;  %vm658_vm5 = vweird.f32 %v652_v23  ;;  %v662_v9 = vand.u32 2147483647, %v652_v23 }
 0x9de   :  { %v665_v30 = vor.u32 1.1754944e-38, %v664_v40  ;;  %vm663_vm7 = vcmp.eq.f32.partialorder %v662_v9, 8.507059e+37 }
 0x9e2   :  { %v2355_v24 = vpop.eup %2354 }
 0x9e3   :  { %v654_v25 = vmul.f32 %v2355_v24, %v652_v23  ;;  %vm659_vm4 = vweird.f32 %v2355_v24 }
 0x9e4   :  { %vm660_vm6 = vmor %vm658_vm5, %vm659_vm4 }
 0x9e5   :  { %v655_v26 = vsub.f32 1.0, %v654_v25 }
 0x9e7   :  { %v656_v27 = vmul.f32 %v2355_v24, %v655_v26 }
 0x9e9   :  { %v657_v28 = vadd.f32 %v2355_v24, %v656_v27 }
 0x9eb   :  { %v661_v29 = vsel %vm660_vm6, %v2355_v24, %v657_v28 }
 0x9ec   :  { %v666_v32 = vsel %vm663_vm7, %v665_v30, %v661_v29 }
 0x9ed   :  { %v669_v34 = vmul.f32 %v666_v32, %v617_v0 }
 0xa32   :  { %v672_v31 = vpop.permute.xlu2 %671 }
 0xa33   :  { %v674_v33 = vmul.f32 %v672_v31, %v666_v32 }
 0xa35   :  { %676 = vrot.lane.b32.xlu0 %v674_v33, %s2699_s18 }
 0xaa7   :  { %v677_v35 = vpop.permute.xlu0 %676 }
 0xaa8   :  { %v3005_v36 = vadd.f32 %v677_v35, %v669_v34 }
 0xaaa   :  { %2356 = vtanh.f32 %v3005_v36 }
 0xab0   :  { %v2357_v37 = vpop.eup %2356 }
 0xab1   :  { %682 = vrot.lane.b32.xlu1 %v2357_v37, %s2699_s18 }
 0xb23   :  { %v683_v38 = vpop.permute.xlu1 %682 }
 0xb24   :  { %v685_v39 = vmul.f32 %v683_v38, %v666_v32 }
 0xb26   :  { %687 = vrot.lane.b32.xlu2 %v685_v39, %s2709_s27 }
 0xb80   :  { %v688_v47 = vpop.permute.xlu2 %687 }
 0xb81   :  { %2243 = vmatmul.msk.f32.vlgmr.msrb.gmra.mxu1 %vm373_vm2, %v688_v47  ;;  %2253 = vmatmul.msk.f32.vlgmr.msrb.gmra.mxu0 %vm373_vm2, %v688_v47 }
 0xb82   :  { %1007 = vmatpush.msrb.mxu1 %v2967_v8  ;;  %1328 = vmatpush.msrb.mxu0 %v3010_v41 }
 0xb84   :  { %1008 = vmatpush.msrb.mxu1 %v2969_v11  ;;  %1329 = vmatpush.msrb.mxu0 %v3012_v43 }
 0xb86   :  { %1009 = vmatpush.msrb.mxu1 %v2973_v13  ;;  %1330 = vmatpush.msrb.mxu0 %v3015_v45 }
 0xb88   :  { %1010 = vmatpush.msrb.mxu1 %v2979_v15  ;;  %1331 = vmatpush.msrb.mxu0 %v3018_v2 }
 0xb89   :  { %2250 = vmatmul.msk.f32.vlgmr.msra.gmra.mxu1 %vm373_vm2, %v2929_v12  ;;  %2257 = vmatmul.msk.f32.vlgmr.msra.gmra.mxu0 %vm373_vm2, %v1058_v3  ;;  %v913_v12 = vadd.f32 %v3043_v51, %v912_v4 }
 0xb8a   :  { %1142 = vmatpush.msra.mxu1 %v3010_v41 }
 0xb8c   :  { %1143 = vmatpush.msra.mxu1 %v3012_v43 }
 0xb8e   :  { %1144 = vmatpush.msra.mxu1 %v3015_v45 }
 0xb90   :  { %1145 = vmatpush.msra.mxu1 %v3018_v2 }
 0xbfe   :  { %v708_v48 = vpop.f32.mrf.mxu1  ;;  %v3041_v49 = vpop.f32.mrf.mxu0 }
 0xbff   :  { %v709_v50 = vadd.f32 %v708_v48, %v323_v6 }
 0xc01   :  { %2358 = vtanh.f32 %v709_v50  ;;  %v2244_v42 = vmul.f32 -1.442695, %v709_v50 }
 0xc06   :  { %v1081_v52 = vpop.f32.mrf.mxu0 }
 0xc07   :  { %v2359_v53 = vpop.eup %2358  ;;  %v1082_v54 = vadd.f32 %v1081_v52, %v913_v12 }
 0xc08   :  { %733 = vrot.lane.b32.xlu0 %v2359_v53, %s2699_s18  ;;  %v346_v53 = vadd.f32 %v2878_v10, %v2933_v14 }
 0xc09   :  { %2360 = vtanh.f32 %v1082_v54  ;;  %v2258_v57 = vmul.f32 -1.442695, %v1082_v54 }
 0xc0a   :  { %2362 = vpow2.f32 %v2244_v42 }
 0xc0b   :  { %2364 = vpow2.f32 %v2258_v57 }
 0xc0f   :  { %v2361_v56 = vpop.eup %2360 }
 0xc10   :  { %1110 = vrot.lane.b32.xlu1 %v2361_v56, %s2699_s18  ;;  %1105 = vrot.lane.b32.xlu0 %v1060_v55, %s2699_s18  ;;  %v2363_v58 = vpop.eup %2362  ;;  %v932_v56 = vpop.f32.mrf.mxu1 }
 0xc11   :  { %v714_v59 = vadd.f32 1.0, %v2363_v58  ;;  %v2365_v60 = vpop.eup %2364  ;;  %v933_v57 = vadd.f32 %v3043_v51, %v932_v56 }
 0xc12   :  { %v1087_v61 = vadd.f32 1.0, %v2365_v60 }
 0xc13   :  { %2366 = vrcp.f32 %v714_v59  ;;  %v726_v19 = vand.u32 2147483648, %v714_v59  ;;  %vm720_vm9 = vweird.f32 %v714_v59  ;;  %v724_v20 = vand.u32 2147483647, %v714_v59 }
 0xc14   :  { %2368 = vrcp.f32 %v1087_v61  ;;  %v1099_v28 = vand.u32 2147483648, %v1087_v61  ;;  %vm1093_vm13 = vweird.f32 %v1087_v61  ;;  %v1097_v40 = vand.u32 2147483647, %v1087_v61 }
 0xc15   :  { %v727_v23 = vor.u32 1.1754944e-38, %v726_v19  ;;  %vm725_vm11 = vcmp.eq.f32.partialorder %v724_v20, 8.507059e+37 }
 0xc16   :  { %v1100_v29 = vor.u32 1.1754944e-38, %v1099_v28  ;;  %vm1098_vm15 = vcmp.eq.f32.partialorder %v1097_v40, 8.507059e+37 }
 0xc19   :  { %v2367_v62 = vpop.eup %2366 }
 0xc1a   :  { %v716_v63 = vmul.f32 %v2367_v62, %v714_v59  ;;  %v2369_v1 = vpop.eup %2368  ;;  %vm721_vm8 = vweird.f32 %v2367_v62 }
 0xc1b   :  { %v1089_v7 = vmul.f32 %v2369_v1, %v1087_v61  ;;  %vm722_vm10 = vmor %vm720_vm9, %vm721_vm8  ;;  %vm1094_vm12 = vweird.f32 %v2369_v1 }
 0xc1c   :  { %v717_v0 = vsub.f32 1.0, %v716_v63  ;;  %vm1095_vm14 = vmor %vm1093_vm13, %vm1094_vm12 }
 0xc1d   :  { %v1090_v18 = vsub.f32 1.0, %v1089_v7 }
 0xc1e   :  { %v718_v5 = vmul.f32 %v2367_v62, %v717_v0 }
 0xc1f   :  { %v1091_v22 = vmul.f32 %v2369_v1, %v1090_v18 }
 0xc20   :  { %v719_v17 = vadd.f32 %v2367_v62, %v718_v5 }
 0xc21   :  { %v1092_v27 = vadd.f32 %v2369_v1, %v1091_v22 }
 0xc22   :  { %v723_v21 = vsel %vm722_vm10, %v2367_v62, %v719_v17 }
 0xc23   :  { %v728_v25 = vsel %vm725_vm11, %v727_v23, %v723_v21  ;;  %v1096_v9 = vsel %vm1095_vm14, %v2369_v1, %v1092_v27 }
 0xc24   :  { %v1101_v31 = vsel %vm1098_vm15, %v1100_v29, %v1096_v9  ;;  %v731_v33 = vmul.f32 %v728_v25, %v3005_v36 }
 0xc7a   :  { %v734_v24 = vpop.permute.xlu0 %733 }
 0xc7b   :  { %v736_v26 = vmul.f32 %v734_v24, %v728_v25 }
 0xc7d   :  { %738 = vrot.lane.b32.xlu2 %v736_v26, %s2699_s18 }
 0xc82   :  { %v1111_v30 = vpop.permute.xlu1 %1110  ;;  %v1106_v38 = vpop.permute.xlu0 %1105 }
 0xc83   :  { %v1113_v32 = vmul.f32 %v1111_v30, %v1101_v31  ;;  %v1108_v39 = vmul.f32 %v1106_v38, %v1101_v31 }
 0xc85   :  { %1115 = vrot.lane.b32.xlu1 %v1113_v32, %s2699_s18 }
 0xcd7   :  { %v739_v34 = vpop.permute.xlu2 %738 }
 0xcd8   :  { %v3052_v35 = vadd.f32 %v739_v34, %v731_v33 }
 0xcda   :  { %2370 = vtanh.f32 %v3052_v35 }
 0xce0   :  { %v2371_v37 = vpop.eup %2370 }
 0xce1   :  { %744 = vrot.lane.b32.xlu2 %v2371_v37, %s2699_s18 }
 0xcf7   :  { %v1116_v47 = vpop.permute.xlu1 %1115 }
 0xcf8   :  { %v3056_v3 = vadd.f32 %v1116_v47, %v1108_v39 }
 0xcfa   :  { %2372 = vtanh.f32 %v3056_v3 }
 0xd00   :  { %v2373_v4 = vpop.eup %2372 }
 0xd01   :  { %1121 = vrot.lane.b32.xlu0 %v2373_v4, %s2699_s18 }
 0xd3b   :  { %v745_v6 = vpop.permute.xlu2 %744 }
 0xd3c   :  { %v747_v36 = vmul.f32 %v745_v6, %v728_v25 }
 0xd3e   :  { %749 = vrot.lane.b32.xlu1 %v747_v36, %s2709_s27 }
 0xd73   :  { %v1122_v48 = vpop.permute.xlu0 %1121 }
 0xd74   :  { %v1124_v50 = vmul.f32 %v1122_v48, %v1101_v31 }
 0xd76   :  { %1126 = vrot.lane.b32.xlu2 %v1124_v50, %s2709_s27 }
 0xdb0   :  { %v750_v12 = vpop.permute.xlu1 %749 }
 0xdb1   :  { %2245 = vmatmul.msk.f32.vlgmr.msrb.gmra.mxu2 %vm373_vm2, %v750_v12  ;;  %2254 = vmatmul.msk.f32.vlgmr.msrb.gmra.mxu1 %vm373_vm2, %v750_v12 }
 0xdb2   :  { %1027 = vmatpush.msrb.mxu2 %v2967_v8  ;;  %1390 = vmatpush.msrb.mxu1 %v3010_v41 }
 0xdb4   :  { %1028 = vmatpush.msrb.mxu2 %v2969_v11  ;;  %1391 = vmatpush.msrb.mxu1 %v3012_v43 }
 0xdb6   :  { %1029 = vmatpush.msrb.mxu2 %v2973_v13  ;;  %1392 = vmatpush.msrb.mxu1 %v3015_v45 }
 0xdb8   :  { %1030 = vmatpush.msrb.mxu2 %v2979_v15  ;;  %1393 = vmatpush.msrb.mxu1 %v3018_v2 }
 0xdb9   :  { %2251 = vmatmul.msk.f32.vlgmr.msra.gmra.mxu2 %vm373_vm2, %v2956_v44 }
 0xdba   :  { %1204 = vmatpush.msra.mxu2 %v3010_v41 }
 0xdbc   :  { %1205 = vmatpush.msra.mxu2 %v3012_v43 }
 0xdbe   :  { %1206 = vmatpush.msra.mxu2 %v3015_v45 }
 0xdc0   :  { %1207 = vmatpush.msra.mxu2 %v3018_v2 }
 0xdd0   :  { %v3078_v52 = vpop.permute.xlu2 %1126 }
 0xdd1   :  { %2259 = vmatmul.msk.f32.vlgmr.msra.gmra.mxu1 %vm373_vm2, %v3078_v52 }
 0xe2e   :  { %v3085_v42 = vpop.f32.mrf.mxu1 }
 0xe34   :  { %v770_v54 = vpop.f32.mrf.mxu2 }
 0xe35   :  { %v771_v55 = vadd.f32 %v770_v54, %v346_v53 }
 0xe37   :  { %2374 = vtanh.f32 %v771_v55  ;;  %v2246_v61 = vmul.f32 -1.442695, %v771_v55 }
 0xe3d   :  { %v2375_v44 = vpop.eup %2374 }
 0xe3e   :  { %795 = vrot.lane.b32.xlu0 %v2375_v44, %s2699_s18 }
 0xe4e   :  { %v1147_v58 = vpop.f32.mrf.mxu1 }
 0xe4f   :  { %v1148_v59 = vadd.f32 %v1147_v58, %v933_v57 }
 0xe51   :  { %2376 = vtanh.f32 %v1148_v59  ;;  %v2260_v0 = vmul.f32 -1.442695, %v1148_v59 }
 0xe52   :  { %2378 = vpow2.f32 %v2246_v61 }
 0xe57   :  { %v2377_v60 = vpop.eup %2376 }
 0xe58   :  { %1172 = vrot.lane.b32.xlu1 %v2377_v60, %s2699_s18  ;;  %v2379_v14 = vpop.eup %2378 }
 0xe59   :  { %v776_v62 = vadd.f32 1.0, %v2379_v14 }
 0xe5b   :  { %2380 = vrcp.f32 %v776_v62  ;;  %v788_v20 = vand.u32 2147483648, %v776_v62  ;;  %vm782_vm1 = vweird.f32 %v776_v62  ;;  %v786_v21 = vand.u32 2147483647, %v776_v62 }
 0xe5c   :  { %2382 = vpow2.f32 %v2260_v0 }
 0xe5d   :  { %v789_v23 = vor.u32 1.1754944e-38, %v788_v20  ;;  %vm787_vm4 = vcmp.eq.f32.partialorder %v786_v21, 8.507059e+37 }
 0xe61   :  { %v2381_v63 = vpop.eup %2380 }
 0xe62   :  { %v778_v1 = vmul.f32 %v2381_v63, %v776_v62  ;;  %v2383_v17 = vpop.eup %2382  ;;  %vm783_vm0 = vweird.f32 %v2381_v63 }
 0xe63   :  { %v1153_v19 = vadd.f32 1.0, %v2383_v17  ;;  %vm784_vm3 = vmor %vm782_vm1, %vm783_vm0  ;;  %vm876_vm1 = vcmask 254976  }
 0xe64   :  { %v779_v5 = vsub.f32 1.0, %v778_v1 }
 0xe65   :  { %2384 = vrcp.f32 %v1153_v19  ;;  %v1165_v30 = vand.u32 2147483648, %v1153_v19  ;;  %vm1159_vm6 = vweird.f32 %v1153_v19  ;;  %v1163_v31 = vand.u32 2147483647, %v1153_v19 }
 0xe66   :  { %v780_v7 = vmul.f32 %v2381_v63, %v779_v5 }
 0xe67   :  { %v1166_v33 = vor.u32 1.1754944e-38, %v1165_v30  ;;  %vm1164_vm8 = vcmp.eq.f32.partialorder %v1163_v31, 8.507059e+37 }
 0xe68   :  { %v781_v18 = vadd.f32 %v2381_v63, %v780_v7 }
 0xe6a   :  { %v785_v22 = vsel %vm784_vm3, %v2381_v63, %v781_v18 }
 0xe6b   :  { %v790_v25 = vsel %vm787_vm4, %v789_v23, %v785_v22  ;;  %v2385_v27 = vpop.eup %2384 }
 0xe6c   :  { %v1155_v28 = vmul.f32 %v2385_v27, %v1153_v19  ;;  %vm1160_vm5 = vweird.f32 %v2385_v27  ;;  %v793_v39 = vmul.f32 %v790_v25, %v3052_v35 }
 0xe6d   :  { %vm1161_vm7 = vmor %vm1159_vm6, %vm1160_vm5 }
 0xe6e   :  { %v1156_v40 = vsub.f32 1.0, %v1155_v28 }
 0xe70   :  { %v1157_v9 = vmul.f32 %v2385_v27, %v1156_v40 }
 0xe72   :  { %v1158_v29 = vadd.f32 %v2385_v27, %v1157_v9 }
 0xe74   :  { %v1162_v32 = vsel %vm1161_vm7, %v2385_v27, %v1158_v29 }
 0xe75   :  { %v1167_v37 = vsel %vm1164_vm8, %v1166_v33, %v1162_v32 }
 0xe76   :  { %v1170_v36 = vmul.f32 %v1167_v37, %v3056_v3  ;;  %v952_v3 = vpop.f32.mrf.mxu2 }
 0xe77   :  { %v953_v57 = vadd.f32 %v3043_v51, %v952_v3 }
 0xeb0   :  { %v796_v24 = vpop.permute.xlu0 %795 }
 0xeb1   :  { %v798_v26 = vmul.f32 %v796_v24, %v790_v25 }
 0xeb3   :  { %800 = vrot.lane.b32.xlu2 %v798_v26, %s2699_s18 }
 0xeca   :  { %v1173_v34 = vpop.permute.xlu1 %1172 }
 0xecb   :  { %v1175_v38 = vmul.f32 %v1173_v34, %v1167_v37 }
 0xecd   :  { %1177 = vrot.lane.b32.xlu0 %v1175_v38, %s2699_s18 }
 0xf0d   :  { %v801_v47 = vpop.permute.xlu2 %800 }
 0xf0e   :  { %v3092_v4 = vadd.f32 %v801_v47, %v793_v39 }
 0xf10   :  { %2386 = vtanh.f32 %v3092_v4 }
 0xf16   :  { %v2387_v6 = vpop.eup %2386 }
 0xf17   :  { %806 = vrot.lane.b32.xlu1 %v2387_v6, %s2699_s18 }
 0xf3f   :  { %v1178_v48 = vpop.permute.xlu0 %1177 }
 0xf40   :  { %v3097_v50 = vadd.f32 %v1178_v48, %v1170_v36 }
 0xf42   :  { %2388 = vtanh.f32 %v3097_v50 }
 0xf48   :  { %v2389_v12 = vpop.eup %2388 }
 0xf49   :  { %1183 = vrot.lane.b32.xlu2 %v2389_v12, %s2699_s18 }
 0xf89   :  { %v807_v53 = vpop.permute.xlu1 %806 }
 0xf8a   :  { %v809_v35 = vmul.f32 %v807_v53, %v790_v25 }
 0xf8c   :  { %811 = vrot.lane.b32.xlu0 %v809_v35, %s2709_s27 }
 0xfa3   :  { %v1184_v54 = vpop.permute.xlu2 %1183 }
 0xfa4   :  { %v1186_v55 = vmul.f32 %v1184_v54, %v1167_v37 }
 0xfa6   :  { %1188 = vrot.lane.b32.xlu1 %v1186_v55, %s2709_s27 }
 0xffe   :  { %v812_v44 = vpop.permute.xlu0 %811 }
 0xfff   :  { %2247 = vmatmul.msk.f32.vlgmr.msrb.gmra.mxu3 %vm373_vm2, %v812_v44  ;;  %2255 = vmatmul.msk.f32.vlgmr.msrb.gmra.mxu2 %vm373_vm2, %v812_v44 }
0x1000   :  { %1049 = vmatpush.msrb.mxu3 %v2967_v8  ;;  %1452 = vmatpush.msrb.mxu2 %v3010_v41 }
0x1002   :  { %1050 = vmatpush.msrb.mxu3 %v2969_v11  ;;  %1453 = vmatpush.msrb.mxu2 %v3012_v43  ;;  %v369_v11 = vadd.f32 %v2878_v10, %v2960_v46 }
0x1004   :  { %1051 = vmatpush.msrb.mxu3 %v2973_v13  ;;  %1454 = vmatpush.msrb.mxu2 %v3015_v45 }
0x1006   :  { %1052 = vmatpush.msrb.mxu3 %v2979_v15  ;;  %1455 = vmatpush.msrb.mxu2 %v3018_v2 }
0x1007   :  { %2252 = vmatmul.msk.f32.vlgmr.msra.gmra.mxu3 %vm373_vm2, %v2991_v16 }
0x1008   :  { %1266 = vmatpush.msra.mxu3 %v3010_v41 }
0x100a   :  { %1267 = vmatpush.msra.mxu3 %v3012_v43 }
0x100c   :  { %1268 = vmatpush.msra.mxu3 %v3015_v45 }
0x100e   :  { %1269 = vmatpush.msra.mxu3 %v3018_v2 }
0x1018   :  { %v3119_v8 = vpop.permute.xlu1 %1188 }
0x1019   :  { %2261 = vmatmul.msk.f32.vlgmr.msra.gmra.mxu2 %vm373_vm2, %v3119_v8 }
0x1082   :  { %v832_v13 = vpop.f32.mrf.mxu3  ;;  %v3126_v56 = vpop.f32.mrf.mxu2 }
0x1083   :  { %v833_v15 = vadd.f32 %v832_v13, %v369_v11 }
0x1085   :  { %2390 = vtanh.f32 %v833_v15  ;;  %v2248_v61 = vmul.f32 -1.442695, %v833_v15 }
0x108a   :  { %v972_v44 = vpop.f32.mrf.mxu3 }
0x108b   :  { %v2391_v16 = vpop.eup %2390  ;;  %v973_v13 = vadd.f32 %v3043_v51, %v972_v44  ;;  %v3206_v44 = vld [vmem:[%s3415_s11] sm:$0xff] }
0x108c   :  { %857 = vrot.lane.b32.xlu2 %v2391_v16, %s2699_s18 }
0x109c   :  { %v1209_v58 = vpop.f32.mrf.mxu2 }
0x109d   :  { %v1210_v59 = vadd.f32 %v1209_v58, %v953_v57 }
0x109f   :  { %2392 = vtanh.f32 %v1210_v59  ;;  %v2262_v22 = vmul.f32 -1.442695, %v1210_v59 }
0x10a0   :  { %2394 = vpow2.f32 %v2248_v61 }
0x10a5   :  { %v2393_v60 = vpop.eup %2392 }
0x10a6   :  { %1234 = vrot.lane.b32.xlu0 %v2393_v60, %s2699_s18  ;;  %v2395_v10 = vpop.eup %2394 }
0x10a7   :  { %v838_v46 = vadd.f32 1.0, %v2395_v10 }
0x10a9   :  { %2396 = vrcp.f32 %v838_v46  ;;  %v850_v5 = vand.u32 2147483648, %v838_v46  ;;  %vm844_vm10 = vweird.f32 %v838_v46  ;;  %v848_v7 = vand.u32 2147483647, %v838_v46 }
0x10aa   :  { %2398 = vpow2.f32 %v2262_v22  ;;  %v3173_v22 = vld [vmem:[%s3413_s9 + $0x8] sm:$0xff] }
0x10ab   :  { %v851_v18 = vor.u32 1.1754944e-38, %v850_v5  ;;  %vm849_vm12 = vcmp.eq.f32.partialorder %v848_v7, 8.507059e+37 }
0x10af   :  { %v2397_v14 = vpop.eup %2396 }
0x10b0   :  { %v840_v62 = vmul.f32 %v2397_v14, %v838_v46  ;;  %vm845_vm9 = vweird.f32 %v2397_v14  ;;  %v2399_v23 = vpop.eup %2398 }
0x10b1   :  { %vm846_vm11 = vmor %vm844_vm10, %vm845_vm9  ;;  %v1215_v24 = vadd.f32 1.0, %v2399_v23  ;;  %v3180_v23 = vld [vmem:[%s3413_s9] sm:$0xff] }
0x10b2   :  { %v841_v63 = vsub.f32 1.0, %v840_v62 }
0x10b3   :  { %2400 = vrcp.f32 %v1215_v24  ;;  %v1227_v9 = vand.u32 2147483648, %v1215_v24  ;;  %vm1221_vm14 = vweird.f32 %v1215_v24  ;;  %v1225_v29 = vand.u32 2147483647, %v1215_v24 }
0x10b4   :  { %v842_v0 = vmul.f32 %v2397_v14, %v841_v63 }
0x10b5   :  { %v1228_v31 = vor.u32 1.1754944e-38, %v1227_v9  ;;  %vm1226_vm0 = vcmp.eq.f32.partialorder %v1225_v29, 8.507059e+37 }
0x10b6   :  { %v843_v1 = vadd.f32 %v2397_v14, %v842_v0 }
0x10b8   :  { %v847_v17 = vsel %vm846_vm11, %v2397_v14, %v843_v1  ;;  %vm1612_vm11 = vcmask 130048  }
0x10b9   :  { %v852_v19 = vsel %vm849_vm12, %v851_v18, %v847_v17  ;;  %v2401_v25 = vpop.eup %2400 }
0x10ba   :  { %v1217_v26 = vmul.f32 %v2401_v25, %v1215_v24  ;;  %vm1222_vm13 = vweird.f32 %v2401_v25  ;;  %v855_v37 = vmul.f32 %v852_v19, %v3092_v4 }
0x10bb   :  { %vm1223_vm15 = vmor %vm1221_vm14, %vm1222_vm13 }
0x10bc   :  { %v1218_v27 = vsub.f32 1.0, %v1217_v26 }
0x10be   :  { %v1219_v28 = vmul.f32 %v2401_v25, %v1218_v27 }
0x10c0   :  { %v1220_v40 = vadd.f32 %v2401_v25, %v1219_v28 }
0x10c2   :  { %v1224_v30 = vsel %vm1223_vm15, %v2401_v25, %v1220_v40  ;;  %v993_v25 = vadd.f32 %v3043_v51, %v3041_v49 }
0x10c3   :  { %v1229_v33 = vsel %vm1226_vm0, %v1228_v31, %v1224_v30 }
0x10c4   :  { %v1232_v6 = vmul.f32 %v1229_v33, %v3097_v50 }
0x10e6   :  { %v858_v20 = vpop.permute.xlu2 %857 }
0x10e7   :  { %v860_v21 = vmul.f32 %v858_v20, %v852_v19  ;;  %v3161_v20 = vld [vmem:[%s3413_s9 + $0x18] sm:$0xff] }
0x10e8   :  { %1603 = vmatpush.msra.mxu0 %v3161_v20 }
0x10e9   :  { %862 = vrot.lane.b32.xlu1 %v860_v21, %s2699_s18  ;;  %v3166_v21 = vld [vmem:[%s3413_s9 + $0x10] sm:$0xff] }
0x10ea   :  { %1604 = vmatpush.msra.mxu0 %v3166_v21 }
0x10ec   :  { %1605 = vmatpush.msra.mxu0 %v3173_v22 }
0x10ee   :  { %1606 = vmatpush.msra.mxu0 %v3180_v23 }
0x1118   :  { %v1235_v32 = vpop.permute.xlu0 %1234 }
0x1119   :  { %v1237_v34 = vmul.f32 %v1235_v32, %v1229_v33 }
0x111b   :  { %1239 = vrot.lane.b32.xlu2 %v1237_v34, %s2699_s18 }
0x115b   :  { %v863_v38 = vpop.permute.xlu1 %862 }
0x115c   :  { %v3133_v39 = vadd.f32 %v863_v38, %v855_v37 }
0x115e   :  { %2402 = vtanh.f32 %v3133_v39 }
0x1164   :  { %v2403_v47 = vpop.eup %2402 }
0x1165   :  { %868 = vrot.lane.b32.xlu0 %v2403_v47, %s2699_s18 }
0x1175   :  { %v1240_v36 = vpop.permute.xlu2 %1239 }
0x1176   :  { %v1242_v48 = vadd.f32 %v1240_v36, %v1232_v6 }
0x1178   :  { %2404 = vtanh.f32 %v1242_v48 }
0x117e   :  { %v2405_v12 = vpop.eup %2404 }
0x117f   :  { %1245 = vrot.lane.b32.xlu1 %v2405_v12, %s2699_s18 }
0x11d7   :  { %v869_v53 = vpop.permute.xlu0 %868 }
0x11d8   :  { %v871_v35 = vmul.f32 %v869_v53, %v852_v19 }
0x11da   :  { %873 = vrot.lane.b32.xlu2 %v871_v35, %s2709_s27 }
0x11f1   :  { %v1246_v4 = vpop.permute.xlu1 %1245 }
0x11f2   :  { %v1248_v54 = vmul.f32 %v1246_v4, %v1229_v33 }
0x11f4   :  { %1250 = vrot.lane.b32.xlu0 %v1248_v54, %s2709_s27 }
0x1234   :  { %v874_v55 = vpop.permute.xlu2 %873 }
0x1235   :  { %877 = vst.msk [vmem:[#allocation15] sm:$0x3] %vm876_vm1, %v874_v55  ;;  %2256 = vmatmul.msk.f32.vlgmr.msrb.gmra.mxu3 %vm373_vm2, %v874_v55  ;;  %v3201_v55 = vld [vmem:[%s3415_s11 + $0x8] sm:$0xff] }
0x1236   :  { %1514 = vmatpush.msrb.mxu3 %v3010_v41  ;;  %1630 = vmatpush.msra.mxu1 %v3201_v55 }
0x1238   :  { %1515 = vmatpush.msrb.mxu3 %v3012_v43  ;;  %1631 = vmatpush.msra.mxu1 %v3206_v44 }
0x123a   :  { %1516 = vmatpush.msrb.mxu3 %v3015_v45 }
0x123c   :  { %1517 = vmatpush.msrb.mxu3 %v3018_v2 }
0x1266   :  { %v3147_v50 = vpop.permute.xlu0 %1250 }
0x1267   :  { %2263 = vmatmul.msk.f32.vlgmr.msra.gmra.mxu3 %vm373_vm2, %v3147_v50 }
0x1268   :  { %1673 = vmatpush.msra.mxu3 %v3161_v20 }
0x126a   :  { %1674 = vmatpush.msra.mxu3 %v3166_v21 }
0x126c   :  { %1675 = vmatpush.msra.mxu3 %v3173_v22 }
0x126e   :  { %1676 = vmatpush.msra.mxu3 %v3180_v23 }
0x12b8   :  { %v3151_v11 = vpop.f32.mrf.mxu3 }
0x12ea   :  { %v1271_v15 = vpop.f32.mrf.mxu3 }
0x12eb   :  { %v1272_v16 = vadd.f32 %v1271_v15, %v973_v13  ;;  %v3215_v13 = vld [vmem:[%s3414_s10] ss:$0 sm:$0xff] }
0x12ed   :  { %2406 = vtanh.f32 %v1272_v16  ;;  %v2264_v43 = vmul.f32 -1.442695, %v1272_v16 }
0x12ef   :  { %2408 = vpow2.f32 %v2264_v43 }
0x12f3   :  { %v2407_v41 = vpop.eup %2406 }
0x12f4   :  { %1296 = vrot.lane.b32.xlu1 %v2407_v41, %s2699_s18 }
0x12f5   :  { %v2409_v45 = vpop.eup %2408 }
0x12f6   :  { %v1277_v2 = vadd.f32 1.0, %v2409_v45  ;;  %v1013_v45 = vadd.f32 %v3043_v51, %v3085_v42 }
0x12f8   :  { %2410 = vrcp.f32 %v1277_v2  ;;  %v1289_v61 = vand.u32 2147483648, %v1277_v2  ;;  %vm1283_vm4 = vweird.f32 %v1277_v2  ;;  %v1287_v10 = vand.u32 2147483647, %v1277_v2 }
0x12fa   :  { %v1290_v14 = vor.u32 1.1754944e-38, %v1289_v61  ;;  %vm1288_vm6 = vcmp.eq.f32.partialorder %v1287_v10, 8.507059e+37 }
0x12fe   :  { %v2411_v3 = vpop.eup %2410 }
0x12ff   :  { %v1279_v57 = vmul.f32 %v2411_v3, %v1277_v2  ;;  %vm1284_vm3 = vweird.f32 %v2411_v3 }
0x1300   :  { %vm1285_vm5 = vmor %vm1283_vm4, %vm1284_vm3 }
0x1301   :  { %v1280_v58 = vsub.f32 1.0, %v1279_v57 }
0x1303   :  { %v1281_v59 = vmul.f32 %v2411_v3, %v1280_v58 }
0x1305   :  { %v1282_v60 = vadd.f32 %v2411_v3, %v1281_v59 }
0x1307   :  { %v1286_v46 = vsel %vm1285_vm5, %v2411_v3, %v1282_v60 }
0x1308   :  { %v1291_v63 = vsel %vm1288_vm6, %v1290_v14, %v1286_v46 }
0x1309   :  { %v1294_v1 = vmul.f32 %v1291_v63, %v1242_v48 }
0x1366   :  { %v1297_v62 = vpop.permute.xlu1 %1296 }
0x1367   :  { %v1299_v0 = vmul.f32 %v1297_v62, %v1291_v63 }
0x1369   :  { %1301 = vrot.lane.b32.xlu2 %v1299_v0, %s2699_s18 }
0x13c3   :  { %v1302_v5 = vpop.permute.xlu2 %1301 }
0x13c4   :  { %v1304_v7 = vadd.f32 %v1302_v5, %v1294_v1 }
0x13c6   :  { %2412 = vtanh.f32 %v1304_v7 }
0x13cc   :  { %v2413_v17 = vpop.eup %2412 }
0x13cd   :  { %1307 = vrot.lane.b32.xlu0 %v2413_v17, %s2699_s18 }
0x143f   :  { %v1308_v18 = vpop.permute.xlu0 %1307 }
0x1440   :  { %v1310_v19 = vmul.f32 %v1308_v18, %v1291_v63 }
0x1442   :  { %1312 = vrot.lane.b32.xlu1 %v1310_v19, %s2709_s27 }
0x14b4   :  { %v3186_v24 = vpop.permute.xlu1 %1312 }
0x14b5   :  { %2265 = vmatmul.msk.f32.vlgmr.msrb.gmra.mxu0 %vm373_vm2, %v3186_v24 }
0x14b6   :  { %1699 = vmatpush.msrb.mxu0 %v3201_v55 }
0x14b8   :  { %1700 = vmatpush.msrb.mxu0 %v3206_v44 }
0x14bd   :  { %2273 = vmatmul.msk.f32.vlgmr.msra.gmra.mxu0 %vm373_vm2, %v3078_v52 }
0x1532   :  { %v1333_v26 = vpop.f32.mrf.mxu0 }
0x1533   :  { %v1334_v27 = vadd.f32 %v1333_v26, %v993_v25 }
0x1535   :  { %2414 = vtanh.f32 %v1334_v27  ;;  %v2266_v40 = vmul.f32 -1.442695, %v1334_v27 }
0x1537   :  { %2416 = vpow2.f32 %v2266_v40  ;;  %v3235_v40 = vld [vmem:[%s3417_s13 + $0x8] sm:$0xff] }
0x1538   :  { %1654 = vmatpush.msra.mxu2 %v3235_v40  ;;  %1793 = vmatpush.msra.mxu0 %v3235_v40 }
0x153a   :  { %v1608_v15 = vpop.f32.mrf.mxu0 }
0x153b   :  { %v2415_v28 = vpop.eup %2414  ;;  %v1609_v41 = vadd.f32 %v3215_v13, %v1608_v15 }
0x153c   :  { %1358 = vrot.lane.b32.xlu2 %v2415_v28, %s2699_s18 }
0x153d   :  { %v2417_v9 = vpop.eup %2416  ;;  %v1611_v43 = vmax.f32 %v1609_v41, 0.0 }
0x153e   :  { %v1339_v29 = vadd.f32 1.0, %v2417_v9  ;;  %v3240_v9 = vld [vmem:[%s3417_s13] sm:$0xff] }
0x153f   :  { %1655 = vmatpush.msra.mxu2 %v3240_v9  ;;  %1794 = vmatpush.msra.mxu0 %v3240_v9 }
0x1540   :  { %2418 = vrcp.f32 %v1339_v29  ;;  %v1351_v52 = vand.u32 2147483648, %v1339_v29  ;;  %vm1345_vm8 = vweird.f32 %v1339_v29  ;;  %v1349_v49 = vand.u32 2147483647, %v1339_v29 }
0x1542   :  { %v1352_v38 = vor.u32 1.1754944e-38, %v1351_v52  ;;  %vm1350_vm10 = vcmp.eq.f32.partialorder %v1349_v49, 8.507059e+37 }
0x1546   :  { %v2419_v30 = vpop.eup %2418 }
0x1547   :  { %v1341_v31 = vmul.f32 %v2419_v30, %v1339_v29  ;;  %vm1346_vm7 = vweird.f32 %v2419_v30  ;;  %v3255_v29 = vld [vmem:[%s3416_s12] ss:$0 sm:$0xff] }
0x1548   :  { %vm1347_vm9 = vmor %vm1345_vm8, %vm1346_vm7 }
0x1549   :  { %v1342_v32 = vsub.f32 1.0, %v1341_v31 }
0x154b   :  { %v1343_v33 = vmul.f32 %v2419_v30, %v1342_v32 }
0x154d   :  { %v1344_v34 = vadd.f32 %v2419_v30, %v1343_v33 }
0x154f   :  { %v1348_v37 = vsel %vm1347_vm9, %v2419_v30, %v1344_v34  ;;  %v1033_v34 = vadd.f32 %v3043_v51, %v3126_v56 }
0x1550   :  { %v1353_v6 = vsel %vm1350_vm10, %v1352_v38, %v1348_v37  ;;  %v3278_v37 = vld [vmem:[%s3418_s14] ss:$0 sm:$0xff]  ;;  %s2710_s14 = smov 96  }
0x1551   :  { %v1356_v48 = vmul.f32 %v1353_v6, %v1304_v7 }
0x1596   :  { %v1359_v47 = vpop.permute.xlu2 %1358 }
0x1597   :  { %v1361_v36 = vmul.f32 %v1359_v47, %v1353_v6 }
0x1599   :  { %1363 = vrot.lane.b32.xlu0 %v1361_v36, %s2699_s18 }
0x160b   :  { %v1364_v12 = vpop.permute.xlu0 %1363 }
0x160c   :  { %v1366_v53 = vadd.f32 %v1364_v12, %v1356_v48 }
0x160e   :  { %2420 = vtanh.f32 %v1366_v53 }
0x1614   :  { %v2421_v35 = vpop.eup %2420 }
0x1615   :  { %1369 = vrot.lane.b32.xlu1 %v2421_v35, %s2699_s18 }
0x1687   :  { %v1370_v4 = vpop.permute.xlu1 %1369 }
0x1688   :  { %v1372_v54 = vmul.f32 %v1370_v4, %v1353_v6 }
0x168a   :  { %1374 = vrot.lane.b32.xlu2 %v1372_v54, %s2709_s27 }
0x16e4   :  { %v3217_v16 = vpop.permute.xlu2 %1374 }
0x16e5   :  { %2267 = vmatmul.msk.f32.vlgmr.msrb.gmra.mxu1 %vm373_vm2, %v3217_v16 }
0x16e6   :  { %1723 = vmatpush.msrb.mxu1 %v3235_v40 }
0x16e8   :  { %1724 = vmatpush.msrb.mxu1 %v3240_v9 }
0x16ed   :  { %2274 = vmatmul.msk.f32.vlgmr.msra.gmra.mxu1 %vm1612_vm11, %v1611_v43 }
0x16ee   :  { %1813 = vmatpush.msra.mxu1 %v3161_v20 }
0x16f0   :  { %1814 = vmatpush.msra.mxu1 %v3166_v21 }
0x16f2   :  { %1815 = vmatpush.msra.mxu1 %v3173_v22 }
0x16f4   :  { %1816 = vmatpush.msra.mxu1 %v3180_v23 }
0x1762   :  { %v1395_v2 = vpop.f32.mrf.mxu1 }
0x1763   :  { %v1396_v3 = vadd.f32 %v1395_v2, %v1013_v45 }
0x1765   :  { %2422 = vtanh.f32 %v1396_v3  ;;  %v2268_v58 = vmul.f32 -1.442695, %v1396_v3 }
0x1767   :  { %2424 = vpow2.f32 %v2268_v58 }
0x176a   :  { %v1633_v30 = vpop.f32.mrf.mxu1 }
0x176b   :  { %v2423_v57 = vpop.eup %2422  ;;  %v1634_v32 = vadd.f32 %v3255_v29, %v1633_v30 }
0x176c   :  { %1420 = vrot.lane.b32.xlu0 %v2423_v57, %s2699_s18 }
0x176d   :  { %v2425_v59 = vpop.eup %2424  ;;  %v1636_v33 = vmax.f32 %v1634_v32, 0.0 }
0x176e   :  { %v1401_v60 = vadd.f32 1.0, %v2425_v59 }
0x1770   :  { %2426 = vrcp.f32 %v1401_v60  ;;  %v1413_v63 = vand.u32 2147483648, %v1401_v60  ;;  %vm1407_vm13 = vweird.f32 %v1401_v60  ;;  %v1411_v42 = vand.u32 2147483647, %v1401_v60 }
0x1772   :  { %v1414_v1 = vor.u32 1.1754944e-38, %v1413_v63  ;;  %vm1412_vm15 = vcmp.eq.f32.partialorder %v1411_v42, 8.507059e+37 }
0x1776   :  { %v2427_v61 = vpop.eup %2426 }
0x1777   :  { %v1403_v10 = vmul.f32 %v2427_v61, %v1401_v60  ;;  %vm1408_vm12 = vweird.f32 %v2427_v61 }
0x1778   :  { %vm1409_vm14 = vmor %vm1407_vm13, %vm1408_vm12 }
0x1779   :  { %v1404_v46 = vsub.f32 1.0, %v1403_v10 }
0x177b   :  { %v1405_v14 = vmul.f32 %v2427_v61, %v1404_v46 }
0x177d   :  { %v1406_v62 = vadd.f32 %v2427_v61, %v1405_v14 }
0x177f   :  { %v1410_v0 = vsel %vm1409_vm14, %v2427_v61, %v1406_v62 }
0x1780   :  { %v1415_v7 = vsel %vm1412_vm15, %v1414_v1, %v1410_v0 }
0x1781   :  { %v1418_v18 = vmul.f32 %v1415_v7, %v1366_v53 }
0x17de   :  { %v1421_v5 = vpop.permute.xlu0 %1420 }
0x17df   :  { %v1423_v17 = vmul.f32 %v1421_v5, %v1415_v7 }
0x17e1   :  { %1425 = vrot.lane.b32.xlu1 %v1423_v17, %s2699_s18 }
0x1853   :  { %v1426_v19 = vpop.permute.xlu1 %1425 }
0x1854   :  { %v3227_v25 = vadd.f32 %v1426_v19, %v1418_v18 }
0x1856   :  { %2428 = vtanh.f32 %v3227_v25 }
0x185c   :  { %v2429_v26 = vpop.eup %2428 }
0x185d   :  { %1431 = vrot.lane.b32.xlu2 %v2429_v26, %s2699_s18 }
0x18b7   :  { %v1432_v27 = vpop.permute.xlu2 %1431 }
0x18b8   :  { %v1434_v28 = vmul.f32 %v1432_v27, %v1415_v7 }
0x18ba   :  { %1436 = vrot.lane.b32.xlu0 %v1434_v28, %s2709_s27 }
0x192c   :  { %v3257_v31 = vpop.permute.xlu0 %1436 }
0x192d   :  { %2269 = vmatmul.msk.f32.vlgmr.msrb.gmra.mxu2 %vm373_vm2, %v3257_v31 }
0x192e   :  { %1743 = vmatpush.msrb.mxu2 %v3161_v20 }
0x1930   :  { %1744 = vmatpush.msrb.mxu2 %v3166_v21 }
0x1932   :  { %1745 = vmatpush.msrb.mxu2 %v3173_v22 }
0x1934   :  { %1746 = vmatpush.msrb.mxu2 %v3180_v23 }
0x1935   :  { %2275 = vmatmul.msk.f32.vlgmr.msra.gmra.mxu2 %vm1612_vm11, %v1636_v33 }
0x1936   :  { %1839 = vmatpush.msra.mxu2 %v3201_v55 }
0x1938   :  { %1840 = vmatpush.msra.mxu2 %v3206_v44 }
0x193d   :  { %2279 = vmatmul.msk.f32.vlgmr.msrb.gmra.mxu2 %vm373_vm2, %v3147_v50 }
0x193e   :  { %1933 = vmatpush.msrb.mxu2 %v3235_v40 }
0x1940   :  { %1934 = vmatpush.msrb.mxu2 %v3240_v9 }
0x19b0   :  { %v1457_v52 = vpop.f32.mrf.mxu2 }
0x19b1   :  { %v1458_v49 = vadd.f32 %v1457_v52, %v1033_v34 }
0x19b3   :  { %2430 = vtanh.f32 %v1458_v49  ;;  %v2270_v50 = vmul.f32 -1.442695, %v1458_v49 }
0x19b5   :  { %2432 = vpow2.f32 %v2270_v50 }
0x19b8   :  { %v1657_v38 = vpop.f32.mrf.mxu2 }
0x19b9   :  { %v2431_v47 = vpop.eup %2430  ;;  %v1658_v6 = vadd.f32 %v3278_v37, %v1657_v38 }
0x19ba   :  { %1482 = vrot.lane.b32.xlu1 %v2431_v47, %s2699_s18 }
0x19bb   :  { %1660 = vst [vmem:[#allocation14] sm:$0x3] %v1658_v6  ;;  %v2433_v36 = vpop.eup %2432 }
0x19bc   :  { %v1463_v48 = vadd.f32 1.0, %v2433_v36 }
0x19be   :  { %2434 = vrcp.f32 %v1463_v48  ;;  %v1475_v54 = vand.u32 2147483648, %v1463_v48  ;;  %vm1469_vm3 = vweird.f32 %v1463_v48  ;;  %v1473_v15 = vand.u32 2147483647, %v1463_v48 }
0x19c0   :  { %v1476_v43 = vor.u32 1.1754944e-38, %v1475_v54  ;;  %vm1474_vm5 = vcmp.eq.f32.partialorder %v1473_v15, 8.507059e+37  ;;  %v1748_v14 = vpop.f32.mrf.mxu2 }
0x19c1   :  { %v1749_v62 = vadd.f32 %v3215_v13, %v1748_v14 }
0x19c3   :  { %v1751_v63 = vmax.f32 %v1749_v62, 0.0 }
0x19c4   :  { %v2435_v56 = vpop.eup %2434 }
0x19c5   :  { %v1465_v12 = vmul.f32 %v2435_v56, %v1463_v48  ;;  %vm1470_vm0 = vweird.f32 %v2435_v56 }
0x19c6   :  { %vm1471_vm4 = vmor %vm1469_vm3, %vm1470_vm0 }
0x19c7   :  { %v1466_v53 = vsub.f32 1.0, %v1465_v12 }
0x19c9   :  { %v1467_v35 = vmul.f32 %v2435_v56, %v1466_v53 }
0x19cb   :  { %v1468_v4 = vadd.f32 %v2435_v56, %v1467_v35 }
0x19cd   :  { %v1472_v41 = vsel %vm1471_vm4, %v2435_v56, %v1468_v4 }
0x19ce   :  { %v1477_v2 = vsel %vm1474_vm5, %v1476_v43, %v1472_v41 }
0x19cf   :  { %v1480_v57 = vmul.f32 %v1477_v2, %v3227_v25 }
0x1a2c   :  { %v1483_v45 = vpop.permute.xlu1 %1482 }
0x1a2d   :  { %v1485_v3 = vmul.f32 %v1483_v45, %v1477_v2 }
0x1a2f   :  { %1487 = vrot.lane.b32.xlu2 %v1485_v3, %s2699_s18 }
0x1a89   :  { %v1488_v58 = vpop.permute.xlu2 %1487 }
0x1a8a   :  { %v3284_v59 = vadd.f32 %v1488_v58, %v1480_v57 }
0x1a8c   :  { %2436 = vtanh.f32 %v3284_v59 }
0x1a92   :  { %v2437_v60 = vpop.eup %2436 }
0x1a93   :  { %1493 = vrot.lane.b32.xlu0 %v2437_v60, %s2699_s18 }
0x1b05   :  { %v1494_v61 = vpop.permute.xlu0 %1493 }
0x1b06   :  { %v1496_v10 = vmul.f32 %v1494_v61, %v1477_v2 }
0x1b08   :  { %1498 = vrot.lane.b32.xlu1 %v1496_v10, %s2709_s27 }
0x1b7a   :  { %v3289_v46 = vpop.permute.xlu1 %1498 }
0x1b7b   :  { %2271 = vmatmul.msk.f32.vlgmr.msrb.gmra.mxu3 %vm373_vm2, %v3289_v46 }
0x1b7c   :  { %1769 = vmatpush.msrb.mxu3 %v3201_v55 }
0x1b7e   :  { %1770 = vmatpush.msrb.mxu3 %v3206_v44 }
0x1b83   :  { %2276 = vmatmul.msk.f32.vlgmr.msra.gmra.mxu3 %vm373_vm2, %v3119_v8  ;;  %v1055_v8 = vadd.f32 %v3043_v51, %v3151_v11 }
0x1b84   :  { %1863 = vmatpush.msra.mxu3 %v3235_v40 }
0x1b86   :  { %1864 = vmatpush.msra.mxu3 %v3240_v9 }
0x1b8b   :  { %2280 = vmatmul.msk.f32.vlgmr.msrb.gmra.mxu3 %vm1612_vm11, %v1751_v63 }
0x1b8c   :  { %1953 = vmatpush.msrb.mxu3 %v3161_v20 }
0x1b8e   :  { %1954 = vmatpush.msrb.mxu3 %v3166_v21 }
0x1b90   :  { %1955 = vmatpush.msrb.mxu3 %v3173_v22 }
0x1b92   :  { %1956 = vmatpush.msrb.mxu3 %v3180_v23 }
0x1bfe   :  { %v1519_v42 = vpop.f32.mrf.mxu3 }
0x1bff   :  { %v1520_v0 = vadd.f32 %v1519_v42, %v1055_v8 }
0x1c01   :  { %2438 = vtanh.f32 %v1520_v0  ;;  %v2272_v11 = vmul.f32 -1.442695, %v1520_v0 }
0x1c03   :  { %2440 = vpow2.f32 %v2272_v11 }
0x1c06   :  { %v1678_v1 = vpop.f32.mrf.mxu3 }
0x1c07   :  { %v2439_v5 = vpop.eup %2438  ;;  %v1679_v7 = vadd.f32 %v3215_v13, %v1678_v1 }
0x1c08   :  { %1544 = vrot.lane.b32.xlu2 %v2439_v5, %s2699_s18 }
0x1c09   :  { %v1681_v17 = vmax.f32 %v1679_v7, 0.0  ;;  %v2441_v25 = vpop.eup %2440 }
0x1c0a   :  { %v1525_v26 = vadd.f32 1.0, %v2441_v25 }
0x1c0b   :  { %2277 = vmatmul.msk.f32.vlgmr.msrb.gmra.mxu0 %vm1612_vm11, %v1681_v17 }
0x1c0c   :  { %1883 = vmatpush.msrb.mxu0 %v3161_v20  ;;  %2442 = vrcp.f32 %v1525_v26  ;;  %v1537_v34 = vand.u32 2147483648, %v1525_v26  ;;  %vm1531_vm7 = vweird.f32 %v1525_v26  ;;  %v1535_v52 = vand.u32 2147483647, %v1525_v26 }
0x1c0e   :  { %v1772_v18 = vpop.f32.mrf.mxu3  ;;  %1884 = vmatpush.msrb.mxu0 %v3166_v21  ;;  %v1538_v49 = vor.u32 1.1754944e-38, %v1537_v34  ;;  %vm1536_vm9 = vcmp.eq.f32.partialorder %v1535_v52, 8.507059e+37 }
0x1c0f   :  { %v1773_v19 = vadd.f32 %v3255_v29, %v1772_v18 }
0x1c10   :  { %1885 = vmatpush.msrb.mxu0 %v3173_v22 }
0x1c11   :  { %v1775_v51 = vmax.f32 %v1773_v19, 0.0 }
0x1c12   :  { %1886 = vmatpush.msrb.mxu0 %v3180_v23  ;;  %v2443_v27 = vpop.eup %2442 }
0x1c13   :  { %2281 = vmatmul.msk.f32.vlgmr.msra.gmra.mxu0 %vm1612_vm11, %v1775_v51  ;;  %v1527_v28 = vmul.f32 %v2443_v27, %v1525_v26  ;;  %vm1532_vm6 = vweird.f32 %v2443_v27 }
0x1c14   :  { %1979 = vmatpush.msra.mxu0 %v3201_v55  ;;  %vm1533_vm8 = vmor %vm1531_vm7, %vm1532_vm6 }
0x1c15   :  { %v1528_v30 = vsub.f32 1.0, %v1527_v28 }
0x1c16   :  { %1980 = vmatpush.msra.mxu0 %v3206_v44 }
0x1c17   :  { %v1529_v32 = vmul.f32 %v2443_v27, %v1528_v30 }
0x1c19   :  { %v1530_v33 = vadd.f32 %v2443_v27, %v1529_v32 }
0x1c1b   :  { %2285 = vmatmul.msk.f32.vlgmr.msrb.gmra.mxu0 %vm373_vm2, %v3217_v16  ;;  %v1534_v16 = vsel %vm1533_vm8, %v2443_v27, %v1530_v33 }
0x1c1c   :  { %2073 = vmatpush.msrb.mxu0 %v3235_v40  ;;  %v1539_v47 = vsel %vm1536_vm9, %v1538_v49, %v1534_v16 }
0x1c1e   :  { %2074 = vmatpush.msrb.mxu0 %v3240_v9 }
0x1c62   :  { %v1545_v38 = vpop.permute.xlu2 %1544 }
0x1c63   :  { %v1547_v6 = vmul.f32 %v1545_v38, %v1539_v47 }
0x1c65   :  { %1549 = vrot.lane.b32.xlu0 %v1547_v6, %s2699_s18 }
0x1c6d   :  { %879 = vrot.lane.b32.xlu0 %v3133_v39, %s2710_s14 }
0x1c88   :  { %v1702_v50 = vpop.f32.mrf.mxu0 }
0x1c89   :  { %v1703_v36 = vadd.f32 %v3255_v29, %v1702_v50 }
0x1c8b   :  { %v1705_v48 = vmax.f32 %v1703_v36, 0.0 }
0x1c8d   :  { %2278 = vmatmul.msk.f32.vlgmr.msrb.gmra.mxu1 %vm1612_vm11, %v1705_v48 }
0x1c8e   :  { %1909 = vmatpush.msrb.mxu1 %v3201_v55 }
0x1c90   :  { %v1796_v56 = vpop.f32.mrf.mxu0  ;;  %1910 = vmatpush.msrb.mxu1 %v3206_v44 }
0x1c91   :  { %v1797_v12 = vadd.f32 %v3278_v37, %v1796_v56 }
0x1c93   :  { %1800 = vst [vmem:[#allocation14 + $0x4] sm:$0x3] %v1797_v12 }
0x1c95   :  { %2282 = vmatmul.msk.f32.vlgmr.msra.gmra.mxu1 %vm373_vm2, %v3186_v24  ;;  %v1542_v24 = vmul.f32 %v1539_v47, %v3284_v59 }
0x1c96   :  { %2003 = vmatpush.msra.mxu1 %v3235_v40 }
0x1c98   :  { %v1888_v39 = vpop.f32.mrf.mxu0  ;;  %2004 = vmatpush.msra.mxu1 %v3240_v9 }
0x1c99   :  { %v1889_v53 = vadd.f32 %v3215_v13, %v1888_v39 }
0x1c9b   :  { %v1891_v35 = vmax.f32 %v1889_v53, 0.0 }
0x1c9d   :  { %2286 = vmatmul.msk.f32.vlgmr.msrb.gmra.mxu1 %vm1612_vm11, %v1891_v35 }
0x1c9e   :  { %2095 = vmatpush.msrb.mxu1 %v3161_v20 }
0x1ca0   :  { %2096 = vmatpush.msrb.mxu1 %v3166_v21 }
0x1ca2   :  { %2097 = vmatpush.msrb.mxu1 %v3173_v22 }
0x1ca4   :  { %2098 = vmatpush.msrb.mxu1 %v3180_v23 }
0x1cd7   :  { %v1550_v4 = vpop.permute.xlu0 %1549 }
0x1cd8   :  { %v1552_v54 = vadd.f32 %v1550_v4, %v1542_v24 }
0x1cda   :  { %2444 = vtanh.f32 %v1552_v54 }
0x1cdf   :  { %v880_v15 = vpop.permute.xlu0 %879 }
0x1ce0   :  { %v2445_v41 = vpop.eup %2444  ;;  %882 = vst.msk [vmem:[#allocation17] sm:$0x3] %vm876_vm1, %v880_v15 }
0x1ce1   :  { %1555 = vrot.lane.b32.xlu1 %v2445_v41, %s2699_s18 }
0x1ce9   :  { %1566 = vrot.lane.b32.xlu1 %v1552_v54, %s2710_s14 }
0x1d0a   :  { %v1726_v43 = vpop.f32.mrf.mxu1 }
0x1d0b   :  { %v1727_v45 = vadd.f32 %v3278_v37, %v1726_v43 }
0x1d0d   :  { %1730 = vst [vmem:[#allocation14 + $0x2] sm:$0x3] %v1727_v45 }
0x1d12   :  { %v1818_v2 = vpop.f32.mrf.mxu1 }
0x1d13   :  { %v1819_v3 = vadd.f32 %v3215_v13, %v1818_v2 }
0x1d15   :  { %v1821_v57 = vmax.f32 %v1819_v3, 0.0 }
0x1d17   :  { %2283 = vmatmul.msk.f32.vlgmr.msra.gmra.mxu2 %vm1612_vm11, %v1821_v57 }
0x1d18   :  { %2023 = vmatpush.msra.mxu2 %v3161_v20 }
0x1d1a   :  { %v1912_v58 = vpop.f32.mrf.mxu1  ;;  %2024 = vmatpush.msra.mxu2 %v3166_v21 }
0x1d1b   :  { %v1913_v59 = vadd.f32 %v3255_v29, %v1912_v58 }
0x1d1c   :  { %2025 = vmatpush.msra.mxu2 %v3173_v22 }
0x1d1d   :  { %v1915_v60 = vmax.f32 %v1913_v59, 0.0 }
0x1d1e   :  { %2026 = vmatpush.msra.mxu2 %v3180_v23 }
0x1d1f   :  { %2287 = vmatmul.msk.f32.vlgmr.msrb.gmra.mxu2 %vm1612_vm11, %v1915_v60 }
0x1d20   :  { %2121 = vmatpush.msrb.mxu2 %v3201_v55 }
0x1d22   :  { %2122 = vmatpush.msrb.mxu2 %v3206_v44 }
0x1d27   :  { %2291 = vmatmul.msk.f32.vlgmr.msra.gmra.mxu2 %vm373_vm2, %v3289_v46 }
0x1d53   :  { %v1556_v20 = vpop.permute.xlu1 %1555 }
0x1d54   :  { %v1558_v61 = vmul.f32 %v1556_v20, %v1539_v47 }
0x1d56   :  { %1560 = vrot.lane.b32.xlu2 %v1558_v61, %s2709_s27  ;;  %s2711_s27 = smov [#allocation15]  }
0x1d57   :  { %s2170_s15 = sshll.u32 %s2711_s27, 4  ;;  %s2171_s15 = int_to_ptr.vmem [resolvable:$true] %s2170_s15 }
0x1d5b   :  { %v1567_v21 = vpop.permute.xlu1 %1566 }
0x1d5c   :  { %1570 = vst.msk [vmem:[#allocation17 + $0x2] sm:$0x3] %vm876_vm1, %v1567_v21 }
0x1d9a   :  { %v1842_v22 = vpop.f32.mrf.mxu2 }
0x1d9b   :  { %v1843_v10 = vadd.f32 %v3255_v29, %v1842_v22 }
0x1d9d   :  { %v1845_v23 = vmax.f32 %v1843_v10, 0.0 }
0x1d9f   :  { %2284 = vmatmul.msk.f32.vlgmr.msra.gmra.mxu3 %vm1612_vm11, %v1845_v23 }
0x1da0   :  { %2049 = vmatpush.msra.mxu3 %v3201_v55 }
0x1da2   :  { %v1936_v14 = vpop.f32.mrf.mxu2  ;;  %2050 = vmatpush.msra.mxu3 %v3206_v44 }
0x1da3   :  { %v1937_v46 = vadd.f32 %v3278_v37, %v1936_v14 }
0x1da5   :  { %1940 = vst [vmem:[#allocation14 + $0x8] sm:$0x3] %v1937_v46 }
0x1da7   :  { %2288 = vmatmul.msk.f32.vlgmr.msrb.gmra.mxu3 %vm373_vm2, %v3257_v31 }
0x1da8   :  { %2145 = vmatpush.msrb.mxu3 %v3235_v40 }
0x1daa   :  { %v2028_v62 = vpop.f32.mrf.mxu2  ;;  %2146 = vmatpush.msrb.mxu3 %v3240_v9 }
0x1dab   :  { %v2029_v63 = vadd.f32 %v3215_v13, %v2028_v62 }
0x1dad   :  { %v2031_v8 = vmax.f32 %v2029_v63, 0.0 }
0x1daf   :  { %2292 = vmatmul.msk.f32.vlgmr.msra.gmra.mxu3 %vm1612_vm11, %v2031_v8 }
0x1db0   :  { %v1561_v55 = vpop.permute.xlu2 %1560 }
0x1db1   :  { %1564 = vst.msk [vmem:[#allocation15 + $0x2] sm:$0x3] %vm876_vm1, %v1561_v55 }
0x1db2   :  { %2178 = dma.vmem_to_hbm [thread:$0]  %s2171_s15, 64, %s2173_s28, [#allocation16], %s2699_s18, %s2699_s18, %s2700_s19  }
0x1db3   :  { %2191 = dma.vmem_to_hbm [thread:$0]  %s2184_s20, 64, %s2186_s21, [#allocation16], %s2699_s18, %s2699_s18, %s2700_s19  }
0x1e22   :  { %v1866_v44 = vpop.f32.mrf.mxu3 }
0x1e23   :  { %v1867_v42 = vadd.f32 %v3278_v37, %v1866_v44 }
0x1e25   :  { %1870 = vst [vmem:[#allocation14 + $0x6] sm:$0x3] %v1867_v42 }
0x1e2a   :  { %v1958_v0 = vpop.f32.mrf.mxu3 }
0x1e2b   :  { %v1959_v31 = vadd.f32 %v3215_v13, %v1958_v0 }
0x1e2d   :  { %v1961_v1 = vmax.f32 %v1959_v31, 0.0 }
0x1e2f   :  { %2289 = vmatmul.msk.f32.vlgmr.msra.gmra.mxu0 %vm1612_vm11, %v1961_v1 }
0x1e32   :  { %v2052_v40 = vpop.f32.mrf.mxu3 }
0x1e33   :  { %v2053_v9 = vadd.f32 %v3255_v29, %v2052_v40 }
0x1e35   :  { %v2055_v5 = vmax.f32 %v2053_v9, 0.0 }
0x1e37   :  { %2293 = vmatmul.msk.f32.vlgmr.msrb.gmra.mxu0 %vm1612_vm11, %v2055_v5 }
0x1eac   :  { %v1982_v7 = vpop.f32.mrf.mxu0 }
0x1ead   :  { %v1983_v17 = vadd.f32 %v3255_v29, %v1982_v7 }
0x1eaf   :  { %v1985_v18 = vmax.f32 %v1983_v17, 0.0 }
0x1eb1   :  { %2290 = vmatmul.msk.f32.vlgmr.msra.gmra.mxu1 %vm1612_vm11, %v1985_v18 }
0x1eb4   :  { %v2076_v19 = vpop.f32.mrf.mxu0 }
0x1eb5   :  { %v2077_v51 = vadd.f32 %v3278_v37, %v2076_v19 }
0x1eb7   :  { %2080 = vst [vmem:[#allocation14 + $0xc] sm:$0x3] %v2077_v51 }
0x1eb9   :  { %2294 = vmatmul.msk.f32.vlgmr.msrb.gmra.mxu1 %vm373_vm2, %v1561_v55 }
0x1f2e   :  { %v2006_v11 = vpop.f32.mrf.mxu1 }
0x1f2f   :  { %v2007_v25 = vadd.f32 %v3278_v37, %v2006_v11 }
0x1f31   :  { %2010 = vst [vmem:[#allocation14 + $0xa] sm:$0x3] %v2007_v25 }
0x1f36   :  { %v2100_v26 = vpop.f32.mrf.mxu1 }
0x1f37   :  { %v2101_v27 = vadd.f32 %v3215_v13, %v2100_v26 }
0x1f39   :  { %v2103_v28 = vmax.f32 %v2101_v27, 0.0 }
0x1f3b   :  { %2295 = vmatmul.msk.f32.vlgmr.msrb.gmra.mxu2 %vm1612_vm11, %v2103_v28 }
0x1fbe   :  { %v2124_v30 = vpop.f32.mrf.mxu2 }
0x1fbf   :  { %v2125_v32 = vadd.f32 %v3255_v29, %v2124_v30 }
0x1fc1   :  { %v2127_v33 = vmax.f32 %v2125_v32, 0.0 }
0x1fc3   :  { %2296 = vmatmul.msk.f32.vlgmr.msrb.gmra.mxu3 %vm1612_vm11, %v2127_v33 }
0x2046   :  { %v2148_v13 = vpop.f32.mrf.mxu3 }
0x2047   :  { %v2149_v29 = vadd.f32 %v3278_v37, %v2148_v13 }
0x2049   :  { %2152 = vst [vmem:[#allocation14 + $0xe] sm:$0x3] %v2149_v29 }
0x204a   :  { %2165 = dma.vmem_to_hbm [thread:$0]  %s2158_s16, 256, %s2160_s22, [#allocation4], %s2699_s18, %s2699_s18, %s2700_s19  }
0x204b   :  { %2694 = dma.done.wait [#allocation4], 256  }
0x204c   :  { %2695 = vsyncadd [#allocation4], 4294967040 }
0x204d   :  { %2696 = dma.done.wait [#allocation16], 128  }
0x204e   :  { %2697 = vsyncadd [#allocation16], 4294967168 }
0x204f   :  { %2204 = vsyncpa [#allocation3], 1 }
0x2050   :  { %2205 = vsyncpa [#allocation6], 1 }
0x2051   :  { %2206 = vsyncpa [#allocation9], 1 }
0x2052   :  { %2207 = vsyncpa [#allocation12], 1 }
0x2053   :  { %2208 = vsyncpa [#allocation4], 1 }
0x2054   :  { %2209 = vsyncpa [#allocation16], 1 }

</bundles_post_ra>
